<compile_context>
chip_gen: v5e
topology: v5e:2x2
jax: 0.10.0
libtpu: 0.0.40
codegen_flags: <defaults>
</compile_context>

<pallas_src>
import jax
import jax.numpy as jnp
from jax import lax
from jax.experimental import pallas as pl
from jax.experimental.pallas import tpu as pltpu


# ---------------------- trace-time weight rearrangement -----------------------
def _fold_conv3x3(w_hwio):
    """Phase-fold a 3x3 / stride-1 / pad-1 conv weight.

    w_hwio: (3, 3, Ci, Co)  ->  (3, 3, 4*Ci, 4*Co) operating on space-to-depth
    (stride-2) folded activations, channel order = (row_phase, col_phase, chan).
    """
    Ci, Co = w_hwio.shape[2], w_hwio.shape[3]
    zeros = jnp.zeros((Ci, Co), w_hwio.dtype)
    rows = []
    for dm in (-1, 0, 1):
        cols = []
        for dn in (-1, 0, 1):
            blk_rows = []
            for p in (0, 1):            # input row phase
                for q in (0, 1):        # input col phase
                    blk_cols = []
                    for a in (0, 1):    # output row phase
                        for b in (0, 1):
                            u = 2 * dm + p + 1 - a
                            v = 2 * dn + q + 1 - b
                            blk_cols.append(w_hwio[u, v]
                                            if 0 <= u <= 2 and 0 <= v <= 2 else zeros)
                    blk_rows.append(jnp.concatenate(blk_cols, axis=1))
            cols.append(jnp.concatenate(blk_rows, axis=0))
        rows.append(jnp.stack(cols, axis=0))
    return jnp.stack(rows, axis=0)                     # (3, 3, 4Ci, 4Co)


def _fold_convtranspose4x4_s2(w_t):
    """ConvTranspose2d(k=4, s=2, p=1, bias=False) as a 3x3 stride-1 conv on the
    (pad-1) low-res input producing phase-folded output.

    w_t: torch layout (Ci, Co, 4, 4)  ->  (3, 3, Ci, 4*Co).
    """
    Ci, Co = w_t.shape[0], w_t.shape[1]
    w_k = w_t.transpose(2, 3, 0, 1)                    # (kh, kw, Ci, Co)
    zeros = jnp.zeros((Ci, Co), w_t.dtype)
    rows = []
    for du in range(3):
        cols = []
        for dv in range(3):
            blk_cols = []
            for ph in (0, 1):           # output row phase
                for pw in (0, 1):       # output col phase
                    kh = ph + 3 - 2 * du
                    kw = pw + 3 - 2 * dv
                    blk_cols.append(w_k[kh, kw]
                                    if 0 <= kh <= 3 and 0 <= kw <= 3 else zeros)
            cols.append(jnp.concatenate(blk_cols, axis=1))
        rows.append(jnp.stack(cols, axis=0))
    return jnp.stack(rows, axis=0)                     # (3, 3, Ci, 4Co)


def _fuse_bn(gamma, beta, mean, var, eps):
    scale = gamma / jnp.sqrt(var + eps)
    return scale, beta - mean * scale


# ------------------------------ fused Pallas kernel ---------------------------
def _make_fused_kernel(H2, W2, Cin, Cs4, Co4):
    HW = H2 * W2

    def im2col3x3(xpad, c):
        # xpad: (H2+2, W2+2, c) value  ->  (H2*W2, 9*c) patch matrix,
        # K ordered (du, dv, channel) to match the row-major reshaped weights.
        cols = []
        for du in range(3):
            for dv in range(3):
                cols.append(xpad[du:du + H2, dv:dv + W2, :].reshape(HW, c))
        return jnp.concatenate(cols, axis=1)

    def kernel(skip_ref, x2_ref, wup_ref, w1_ref, b1_ref, w2_ref, b2_ref,
               o_ref, up_s, h_s):
        # Zero the VMEM intermediates; their borders provide the 3x3 conv padding.
        # (Re-zeroed every grid step on purpose: scratch is per-core and the grid
        #  may be sharded across TensorCores, so a pid==0-only init is unsafe.)
        up_s[...] = jnp.zeros_like(up_s)
        h_s[...] = jnp.zeros_like(h_s)

        # --- ConvTranspose2d(4x4, s=2, p=1), phase-decomposed: one K=9*Cin matmul
        #     producing all 4 output phases at once (phase-folded layout). ---
        p_up = im2col3x3(x2_ref[0], Cin)                                 # (HW, 9*Cin)
        up = jnp.dot(p_up, wup_ref[...], preferred_element_type=jnp.float32)
        up_s[1:H2 + 1, 1:W2 + 1, :] = up.reshape(H2, W2, Co4)

        # --- conv1 + BN(eval) + ReLU; skip/up concat happens at the patch level. ---
        patches = jnp.concatenate(
            [im2col3x3(skip_ref[0], Cs4), im2col3x3(up_s[...], Co4)], axis=1)
        h = jnp.dot(patches, w1_ref[...], preferred_element_type=jnp.float32)
        h = jnp.maximum(h + b1_ref[...], 0.0)
        h_s[1:H2 + 1, 1:W2 + 1, :] = h.reshape(H2, W2, Co4)

        # --- conv2 + BN(eval) + ReLU ---
        p2 = im2col3x3(h_s[...], Co4)
        y = jnp.dot(p2, w2_ref[...], preferred_element_type=jnp.float32)
        y = jnp.maximum(y + b2_ref[...], 0.0)
        o_ref[...] = y.reshape(1, H2, W2, Co4).astype(o_ref.dtype)

    return kernel


# ----------------------------------- wrapper ----------------------------------
def up_module_forward(x1_nchw, x2_nchw, p, eps=1e-5):
    """Pallas implementation of UpModule.forward. Inputs/outputs NCHW (PyTorch)."""
    N, Cs, H1x, W1x = x1_nchw.shape
    _, Cin, H2, W2 = x2_nchw.shape
    Co = p["w_up"].shape[1]
    H1, W1 = 2 * H2, 2 * W2
    assert Cs == Co, "skip channels must equal ConvTranspose out channels"

    # F.pad([offset // 2] * 4) with offset computed from the height dim (PyTorch spec).
    offset = H1 - H1x
    pad = offset // 2
    assert offset >= 0 and offset % 2 == 0, "odd/negative skip offset not supported"
    assert H1x + 2 * pad == H1 and W1x + 2 * pad == W1, "skip shape mismatch after pad"

    dt = x1_nchw.dtype

    # ---- trace-time weight prep: BN scale folded in, phase-folded matmul forms ----
    s1, b1 = _fuse_bn(p["gamma1"], p["beta1"], p["mean1"], p["var1"], eps)
    s2, b2 = _fuse_bn(p["gamma2"], p["beta2"], p["mean2"], p["var2"], eps)

    wup_mat = _fold_convtranspose4x4_s2(p["w_up"]).reshape(9 * Cin, 4 * Co)

    w1_hwio = p["w1"].transpose(2, 3, 1, 0) * s1[None, None, None, :]    # (3,3,2Co,Co)
    w1s_mat = _fold_conv3x3(w1_hwio[:, :, :Co, :]).reshape(9 * 4 * Co, 4 * Co)
    w1u_mat = _fold_conv3x3(w1_hwio[:, :, Co:, :]).reshape(9 * 4 * Co, 4 * Co)
    w1_mat = jnp.concatenate([w1s_mat, w1u_mat], axis=0)                 # (288, 16)
    b1_f = jnp.tile(b1, 4).reshape(1, 4 * Co)

    w2_hwio = p["w2"].transpose(2, 3, 1, 0) * s2[None, None, None, :]    # (3,3,Co,Co)
    w2_mat = _fold_conv3x3(w2_hwio).reshape(9 * 4 * Co, 4 * Co)          # (144, 16)
    b2_f = jnp.tile(b2, 4).reshape(1, 4 * Co)

    # ---- input prep (XLA, once): NCHW->NHWC, skip pad, phase fold, conv pad ----
    x2n = jnp.pad(x2_nchw.transpose(0, 2, 3, 1), ((0, 0), (1, 1), (1, 1), (0, 0)))
    lsc = jnp.pad(x1_nchw.transpose(0, 2, 3, 1), ((0, 0), (pad, pad), (pad, pad), (0, 0)))
    skip_f = (lsc.reshape(N, H2, 2, W2, 2, Cs)
                 .transpose(0, 1, 3, 2, 4, 5)
                 .reshape(N, H2, W2, 4 * Cs))
    skip_f = jnp.pad(skip_f, ((0, 0), (1, 1), (1, 1), (0, 0)))

    # advisory cost hint (all shapes static)
    flops = 2 * N * H2 * W2 * (4 * Co) * (9 * Cin + 9 * 4 * Cs + 2 * 9 * 4 * Co)
    bytes_accessed = 4 * int(skip_f.size + x2n.size + wup_mat.size + w1_mat.size
                             + w2_mat.size + b1_f.size + b2_f.size
                             + N * H2 * W2 * 4 * Co)

    out_f = pl.pallas_call(
        _make_fused_kernel(H2, W2, Cin, 4 * Cs, 4 * Co),
        out_shape=jax.ShapeDtypeStruct((N, H2, W2, 4 * Co), dt),
        grid=(N,),
        in_specs=[
            pl.BlockSpec((1, H2 + 2, W2 + 2, 4 * Cs), lambda n: (n, 0, 0, 0)),
            pl.BlockSpec((1, H2 + 2, W2 + 2, Cin), lambda n: (n, 0, 0, 0)),
            pl.BlockSpec(wup_mat.shape, lambda n: (0, 0)),
            pl.BlockSpec(w1_mat.shape, lambda n: (0, 0)),
            pl.BlockSpec(b1_f.shape, lambda n: (0, 0)),
            pl.BlockSpec(w2_mat.shape, lambda n: (0, 0)),
            pl.BlockSpec(b2_f.shape, lambda n: (0, 0)),
        ],
        out_specs=pl.BlockSpec((1, H2, W2, 4 * Co), lambda n: (n, 0, 0, 0)),
        scratch_shapes=[
            pltpu.VMEM((H2 + 2, W2 + 2, 4 * Co), jnp.float32),   # up (phase-folded, padded)
            pltpu.VMEM((H2 + 2, W2 + 2, 4 * Co), jnp.float32),   # hidden h (padded)
        ],
        compiler_params=pltpu.CompilerParams(dimension_semantics=("parallel",)),
        cost_estimate=pl.CostEstimate(flops=flops, transcendentals=0,
                                      bytes_accessed=bytes_accessed),
    )(skip_f, x2n, wup_mat, w1_mat, b1_f, w2_mat, b2_f)

    # ---- unfold phases + back to NCHW ----
    out = (out_f.reshape(N, H2, W2, 2, 2, Co)
                .transpose(0, 5, 1, 3, 2, 4)
                .reshape(N, Co, H1, W1))
    return out


# ------------------------- pure-JAX reference (NCHW) --------------------------
def ref_forward(x1, x2, p, eps=1e-5):
    w_up_oihw = jnp.flip(p["w_up"], axis=(2, 3)).transpose(1, 0, 2, 3)
    up = lax.conv_general_dilated(x2, w_up_oihw, (1, 1), [(2, 2), (2, 2)],
                                  lhs_dilation=(2, 2),
                                  dimension_numbers=("NCHW", "OIHW", "NCHW"))
    off = (up.shape[2] - x1.shape[2]) // 2
    lsc = jnp.pad(x1, ((0, 0), (0, 0), (off, off), (off, off)))
    cat = jnp.concatenate([lsc, up], axis=1)

    def cna(x, w, g, b, m, v):
        y = lax.conv_general_dilated(x, w, (1, 1), [(1, 1), (1, 1)],
                                     dimension_numbers=("NCHW", "OIHW", "NCHW"))
        y = (y - m[None, :, None, None]) / jnp.sqrt(v[None, :, None, None] + eps)
        y = y * g[None, :, None, None] + b[None, :, None, None]
        return jnp.maximum(y, 0.0)

    h = cna(cat, p["w1"], p["gamma1"], p["beta1"], p["mean1"], p["var1"])
    return cna(h, p["w2"], p["gamma2"], p["beta2"], p["mean2"], p["var2"])


# ------------------------------------ main ------------------------------------
if __name__ == "__main__":
    in_c, out_c = 8, 4
    N, H2, W2 = 2, 8, 8                     # x2: (N, in_c, 8, 8)
    H1, W1 = 2 * H2, 2 * W2                 # x1: (N, out_c, 16, 16)

    keys = jax.random.split(jax.random.PRNGKey(0), 12)
    params = {
        "w_up":   jax.random.normal(keys[0], (in_c, out_c, 4, 4), jnp.float32) * 0.1,
        "w1":     jax.random.normal(keys[1], (out_c, out_c * 2, 3, 3), jnp.float32) * 0.1,
        "w2":     jax.random.normal(keys[2], (out_c, out_c, 3, 3), jnp.float32) * 0.1,
        "gamma1": 1.0 + 0.1 * jax.random.normal(keys[3], (out_c,), jnp.float32),
        "beta1":  0.1 * jax.random.normal(keys[4], (out_c,), jnp.float32),
        "mean1":  0.1 * jax.random.normal(keys[5], (out_c,), jnp.float32),
        "var1":   1.0 + 0.1 * jnp.abs(jax.random.normal(keys[6], (out_c,), jnp.float32)),
        "gamma2": 1.0 + 0.1 * jax.random.normal(keys[7], (out_c,), jnp.float32),
        "beta2":  0.1 * jax.random.normal(keys[8], (out_c,), jnp.float32),
        "mean2":  0.1 * jax.random.normal(keys[9], (out_c,), jnp.float32),
        "var2":   1.0 + 0.1 * jnp.abs(jax.random.normal(keys[10], (out_c,), jnp.float32)),
    }

    kx = jax.random.split(keys[11], 2)
    x1 = jax.random.normal(kx[0], (N, out_c, H1, W1), jnp.float32)
    x2 = jax.random.normal(kx[1], (N, in_c, H2, W2), jnp.float32)

    fwd = jax.jit(up_module_forward)
    out = jax.block_until_ready(fwd(x1, x2, params))
    ref = jax.block_until_ready(ref_forward(x1, x2, params))

    assert out.shape == (N, out_c, H1, W1), out.shape
    assert jnp.allclose(out, ref, atol=1e-3, rtol=1e-3), float(jnp.max(jnp.abs(out - ref)))
    print("KERNEL_OK")
</pallas_src>

<mosaic_0001>
module attributes {stable_mosaic.version = 11 : i64} {
  func.func @kernel(%arg0: i32, %arg1: memref<1x10x10x16xf32, #tpu.memory_space<vmem>>, %arg2: memref<1x10x10x8xf32, #tpu.memory_space<vmem>>, %arg3: memref<72x16xf32, #tpu.memory_space<vmem>>, %arg4: memref<288x16xf32, #tpu.memory_space<vmem>>, %arg5: memref<1x16xf32, #tpu.memory_space<vmem>>, %arg6: memref<144x16xf32, #tpu.memory_space<vmem>>, %arg7: memref<1x16xf32, #tpu.memory_space<vmem>>, %arg8: memref<1x8x8x16xf32, #tpu.memory_space<vmem>>, %arg9: memref<10x10x16xf32, #tpu.memory_space<vmem>>, %arg10: memref<10x10x16xf32, #tpu.memory_space<vmem>>) attributes {dimension_semantics = [#tpu.dimension_semantics<parallel>], iteration_bounds = array<i64: 2>, scalar_prefetch = 0 : i64, scratch_operands = 2 : i64, tpu.core_type = #tpu.core_type<tc>, window_params = [{transform_indices = @transform_0, window_bounds = array<i64: 1, 10, 10, 16>}, {transform_indices = @transform_1, window_bounds = array<i64: 1, 10, 10, 8>}, {pipeline_mode = #tpu.pipeline_mode<synchronous>, transform_indices = @transform_2, window_bounds = array<i64: 72, 16>}, {pipeline_mode = #tpu.pipeline_mode<synchronous>, transform_indices = @transform_3, window_bounds = array<i64: 288, 16>}, {pipeline_mode = #tpu.pipeline_mode<synchronous>, transform_indices = @transform_4, window_bounds = array<i64: 1, 16>}, {pipeline_mode = #tpu.pipeline_mode<synchronous>, transform_indices = @transform_5, window_bounds = array<i64: 144, 16>}, {pipeline_mode = #tpu.pipeline_mode<synchronous>, transform_indices = @transform_6, window_bounds = array<i64: 1, 16>}, {transform_indices = @transform_7, window_bounds = array<i64: 1, 8, 8, 16>}]} {
    %cst = arith.constant 0.000000e+00 : f32
    %0 = vector.broadcast %cst : f32 to vector<10x10x16xf32>
    %c0 = arith.constant 0 : index
    %c0_0 = arith.constant 0 : index
    %c0_1 = arith.constant 0 : index
    %1 = vector.load %arg9[%c0, %c0_0, %c0_1] : memref<10x10x16xf32, #tpu.memory_space<vmem>>, vector<10x10x16xf32>
    tpu.vector_store %arg9[%c0, %c0_0, %c0_1], %0 {strides = array<i32>} : memref<10x10x16xf32, #tpu.memory_space<vmem>>, vector<10x10x16xf32>,
    %cst_2 = arith.constant 0.000000e+00 : f32
    %2 = vector.broadcast %cst_2 : f32 to vector<10x10x16xf32>
    %c0_3 = arith.constant 0 : index
    %c0_4 = arith.constant 0 : index
    %c0_5 = arith.constant 0 : index
    %3 = vector.load %arg10[%c0_3, %c0_4, %c0_5] : memref<10x10x16xf32, #tpu.memory_space<vmem>>, vector<10x10x16xf32>
    tpu.vector_store %arg10[%c0_3, %c0_4, %c0_5], %2 {strides = array<i32>} : memref<10x10x16xf32, #tpu.memory_space<vmem>>, vector<10x10x16xf32>,
    %c0_6 = arith.constant 0 : index
    %c0_7 = arith.constant 0 : index
    %c0_8 = arith.constant 0 : index
    %c0_9 = arith.constant 0 : index
    %4 = vector.load %arg2[%c0_6, %c0_7, %c0_8, %c0_9] : memref<1x10x10x8xf32, #tpu.memory_space<vmem>>, vector<1x10x10x8xf32>
    %5 = vector.shape_cast %4 : vector<1x10x10x8xf32> to vector<10x10x8xf32>
    %6 = vector.extract_strided_slice %5 {offsets = [0, 0, 0], sizes = [8, 8, 8], strides = [1, 1, 1]} : vector<10x10x8xf32> to vector<8x8x8xf32>
    %7 = vector.shape_cast %6 : vector<8x8x8xf32> to vector<64x8xf32>
    %8 = vector.extract_strided_slice %5 {offsets = [0, 1, 0], sizes = [8, 8, 8], strides = [1, 1, 1]} : vector<10x10x8xf32> to vector<8x8x8xf32>
    %9 = vector.shape_cast %8 : vector<8x8x8xf32> to vector<64x8xf32>
    %10 = vector.extract_strided_slice %5 {offsets = [0, 2, 0], sizes = [8, 8, 8], strides = [1, 1, 1]} : vector<10x10x8xf32> to vector<8x8x8xf32>
    %11 = vector.shape_cast %10 : vector<8x8x8xf32> to vector<64x8xf32>
    %12 = vector.extract_strided_slice %5 {offsets = [1, 0, 0], sizes = [8, 8, 8], strides = [1, 1, 1]} : vector<10x10x8xf32> to vector<8x8x8xf32>
    %13 = vector.shape_cast %12 : vector<8x8x8xf32> to vector<64x8xf32>
    %14 = vector.extract_strided_slice %5 {offsets = [1, 1, 0], sizes = [8, 8, 8], strides = [1, 1, 1]} : vector<10x10x8xf32> to vector<8x8x8xf32>
    %15 = vector.shape_cast %14 : vector<8x8x8xf32> to vector<64x8xf32>
    %16 = vector.extract_strided_slice %5 {offsets = [1, 2, 0], sizes = [8, 8, 8], strides = [1, 1, 1]} : vector<10x10x8xf32> to vector<8x8x8xf32>
    %17 = vector.shape_cast %16 : vector<8x8x8xf32> to vector<64x8xf32>
    %18 = vector.extract_strided_slice %5 {offsets = [2, 0, 0], sizes = [8, 8, 8], strides = [1, 1, 1]} : vector<10x10x8xf32> to vector<8x8x8xf32>
    %19 = vector.shape_cast %18 : vector<8x8x8xf32> to vector<64x8xf32>
    %20 = vector.extract_strided_slice %5 {offsets = [2, 1, 0], sizes = [8, 8, 8], strides = [1, 1, 1]} : vector<10x10x8xf32> to vector<8x8x8xf32>
    %21 = vector.shape_cast %20 : vector<8x8x8xf32> to vector<64x8xf32>
    %22 = vector.extract_strided_slice %5 {offsets = [2, 2, 0], sizes = [8, 8, 8], strides = [1, 1, 1]} : vector<10x10x8xf32> to vector<8x8x8xf32>
    %23 = vector.shape_cast %22 : vector<8x8x8xf32> to vector<64x8xf32>
    %24 = tpu.concatenate %7, %9, %11, %13, %15, %17, %19, %21, %23 in 1 : vector<64x8xf32>, vector<64x8xf32>, vector<64x8xf32>, vector<64x8xf32>, vector<64x8xf32>, vector<64x8xf32>, vector<64x8xf32>, vector<64x8xf32>, vector<64x8xf32> -> vector<64x72xf32>
    %c0_10 = arith.constant 0 : index
    %c0_11 = arith.constant 0 : index
    %25 = vector.load %arg3[%c0_10, %c0_11] : memref<72x16xf32, #tpu.memory_space<vmem>>, vector<72x16xf32>
    %cst_12 = arith.constant dense<0.000000e+00> : vector<64x16xf32>
    %26 = tpu.matmul %24, %25, %cst_12 {dimension_numbers = #tpu.dot_dimension_numbers<[1], [0], [0], [1], [0, 0, 1, 1], [], []>} : vector<64x72xf32>, vector<72x16xf32>, vector<64x16xf32> -> vector<64x16xf32>
    %27 = vector.shape_cast %26 : vector<64x16xf32> to vector<8x8x16xf32>
    %c1 = arith.constant 1 : index
    %c1_13 = arith.constant 1 : index
    %c0_14 = arith.constant 0 : index
    %28 = vector.load %arg9[%c1, %c1_13, %c0_14] : memref<10x10x16xf32, #tpu.memory_space<vmem>>, vector<8x8x16xf32>
    tpu.vector_store %arg9[%c1, %c1_13, %c0_14], %27 {strides = array<i32>} : memref<10x10x16xf32, #tpu.memory_space<vmem>>, vector<8x8x16xf32>,
    %c0_15 = arith.constant 0 : index
    %c0_16 = arith.constant 0 : index
    %c0_17 = arith.constant 0 : index
    %c0_18 = arith.constant 0 : index
    %29 = vector.load %arg1[%c0_15, %c0_16, %c0_17, %c0_18] : memref<1x10x10x16xf32, #tpu.memory_space<vmem>>, vector<1x10x10x16xf32>
    %30 = vector.shape_cast %29 : vector<1x10x10x16xf32> to vector<10x10x16xf32>
    %31 = vector.extract_strided_slice %30 {offsets = [0, 0, 0], sizes = [8, 8, 16], strides = [1, 1, 1]} : vector<10x10x16xf32> to vector<8x8x16xf32>
    %32 = vector.shape_cast %31 : vector<8x8x16xf32> to vector<64x16xf32>
    %33 = vector.extract_strided_slice %30 {offsets = [0, 1, 0], sizes = [8, 8, 16], strides = [1, 1, 1]} : vector<10x10x16xf32> to vector<8x8x16xf32>
    %34 = vector.shape_cast %33 : vector<8x8x16xf32> to vector<64x16xf32>
    %35 = vector.extract_strided_slice %30 {offsets = [0, 2, 0], sizes = [8, 8, 16], strides = [1, 1, 1]} : vector<10x10x16xf32> to vector<8x8x16xf32>
    %36 = vector.shape_cast %35 : vector<8x8x16xf32> to vector<64x16xf32>
    %37 = vector.extract_strided_slice %30 {offsets = [1, 0, 0], sizes = [8, 8, 16], strides = [1, 1, 1]} : vector<10x10x16xf32> to vector<8x8x16xf32>
    %38 = vector.shape_cast %37 : vector<8x8x16xf32> to vector<64x16xf32>
    %39 = vector.extract_strided_slice %30 {offsets = [1, 1, 0], sizes = [8, 8, 16], strides = [1, 1, 1]} : vector<10x10x16xf32> to vector<8x8x16xf32>
    %40 = vector.shape_cast %39 : vector<8x8x16xf32> to vector<64x16xf32>
    %41 = vector.extract_strided_slice %30 {offsets = [1, 2, 0], sizes = [8, 8, 16], strides = [1, 1, 1]} : vector<10x10x16xf32> to vector<8x8x16xf32>
    %42 = vector.shape_cast %41 : vector<8x8x16xf32> to vector<64x16xf32>
    %43 = vector.extract_strided_slice %30 {offsets = [2, 0, 0], sizes = [8, 8, 16], strides = [1, 1, 1]} : vector<10x10x16xf32> to vector<8x8x16xf32>
    %44 = vector.shape_cast %43 : vector<8x8x16xf32> to vector<64x16xf32>
    %45 = vector.extract_strided_slice %30 {offsets = [2, 1, 0], sizes = [8, 8, 16], strides = [1, 1, 1]} : vector<10x10x16xf32> to vector<8x8x16xf32>
    %46 = vector.shape_cast %45 : vector<8x8x16xf32> to vector<64x16xf32>
    %47 = vector.extract_strided_slice %30 {offsets = [2, 2, 0], sizes = [8, 8, 16], strides = [1, 1, 1]} : vector<10x10x16xf32> to vector<8x8x16xf32>
    %48 = vector.shape_cast %47 : vector<8x8x16xf32> to vector<64x16xf32>
    %49 = tpu.concatenate %32, %34, %36, %38, %40, %42, %44, %46, %48 in 1 : vector<64x16xf32>, vector<64x16xf32>, vector<64x16xf32>, vector<64x16xf32>, vector<64x16xf32>, vector<64x16xf32>, vector<64x16xf32>, vector<64x16xf32>, vector<64x16xf32> -> vector<64x144xf32>
    %c0_19 = arith.constant 0 : index
    %c0_20 = arith.constant 0 : index
    %c0_21 = arith.constant 0 : index
    %50 = vector.load %arg9[%c0_19, %c0_20, %c0_21] : memref<10x10x16xf32, #tpu.memory_space<vmem>>, vector<10x10x16xf32>
    %51 = vector.extract_strided_slice %50 {offsets = [0, 0, 0], sizes = [8, 8, 16], strides = [1, 1, 1]} : vector<10x10x16xf32> to vector<8x8x16xf32>
    %52 = vector.shape_cast %51 : vector<8x8x16xf32> to vector<64x16xf32>
    %53 = vector.extract_strided_slice %50 {offsets = [0, 1, 0], sizes = [8, 8, 16], strides = [1, 1, 1]} : vector<10x10x16xf32> to vector<8x8x16xf32>
    %54 = vector.shape_cast %53 : vector<8x8x16xf32> to vector<64x16xf32>
    %55 = vector.extract_strided_slice %50 {offsets = [0, 2, 0], sizes = [8, 8, 16], strides = [1, 1, 1]} : vector<10x10x16xf32> to vector<8x8x16xf32>
    %56 = vector.shape_cast %55 : vector<8x8x16xf32> to vector<64x16xf32>
    %57 = vector.extract_strided_slice %50 {offsets = [1, 0, 0], sizes = [8, 8, 16], strides = [1, 1, 1]} : vector<10x10x16xf32> to vector<8x8x16xf32>
    %58 = vector.shape_cast %57 : vector<8x8x16xf32> to vector<64x16xf32>
    %59 = vector.extract_strided_slice %50 {offsets = [1, 1, 0], sizes = [8, 8, 16], strides = [1, 1, 1]} : vector<10x10x16xf32> to vector<8x8x16xf32>
    %60 = vector.shape_cast %59 : vector<8x8x16xf32> to vector<64x16xf32>
    %61 = vector.extract_strided_slice %50 {offsets = [1, 2, 0], sizes = [8, 8, 16], strides = [1, 1, 1]} : vector<10x10x16xf32> to vector<8x8x16xf32>
    %62 = vector.shape_cast %61 : vector<8x8x16xf32> to vector<64x16xf32>
    %63 = vector.extract_strided_slice %50 {offsets = [2, 0, 0], sizes = [8, 8, 16], strides = [1, 1, 1]} : vector<10x10x16xf32> to vector<8x8x16xf32>
    %64 = vector.shape_cast %63 : vector<8x8x16xf32> to vector<64x16xf32>
    %65 = vector.extract_strided_slice %50 {offsets = [2, 1, 0], sizes = [8, 8, 16], strides = [1, 1, 1]} : vector<10x10x16xf32> to vector<8x8x16xf32>
    %66 = vector.shape_cast %65 : vector<8x8x16xf32> to vector<64x16xf32>
    %67 = vector.extract_strided_slice %50 {offsets = [2, 2, 0], sizes = [8, 8, 16], strides = [1, 1, 1]} : vector<10x10x16xf32> to vector<8x8x16xf32>
    %68 = vector.shape_cast %67 : vector<8x8x16xf32> to vector<64x16xf32>
    %69 = tpu.concatenate %52, %54, %56, %58, %60, %62, %64, %66, %68 in 1 : vector<64x16xf32>, vector<64x16xf32>, vector<64x16xf32>, vector<64x16xf32>, vector<64x16xf32>, vector<64x16xf32>, vector<64x16xf32>, vector<64x16xf32>, vector<64x16xf32> -> vector<64x144xf32>
    %70 = tpu.concatenate %49, %69 in 1 : vector<64x144xf32>, vector<64x144xf32> -> vector<64x288xf32>
    %c0_22 = arith.constant 0 : index
    %c0_23 = arith.constant 0 : index
    %71 = vector.load %arg4[%c0_22, %c0_23] : memref<288x16xf32, #tpu.memory_space<vmem>>, vector<288x16xf32>
    %cst_24 = arith.constant dense<0.000000e+00> : vector<64x16xf32>
    %72 = tpu.matmul %70, %71, %cst_24 {dimension_numbers = #tpu.dot_dimension_numbers<[1], [0], [0], [1], [0, 0, 1, 1], [], []>} : vector<64x288xf32>, vector<288x16xf32>, vector<64x16xf32> -> vector<64x16xf32>
    %c0_25 = arith.constant 0 : index
    %c0_26 = arith.constant 0 : index
    %73 = vector.load %arg5[%c0_25, %c0_26] : memref<1x16xf32, #tpu.memory_space<vmem>>, vector<1x16xf32>
    %74 = vector.broadcast %73 : vector<1x16xf32> to vector<64x16xf32>
    %75 = arith.addf %72, %74 : vector<64x16xf32>
    %cst_27 = arith.constant 0.000000e+00 : f32
    %76 = vector.broadcast %cst_27 : f32 to vector<64x16xf32>
    %77 = arith.maximumf %75, %76 : vector<64x16xf32>
    %78 = vector.shape_cast %77 : vector<64x16xf32> to vector<8x8x16xf32>
    %c1_28 = arith.constant 1 : index
    %c1_29 = arith.constant 1 : index
    %c0_30 = arith.constant 0 : index
    %79 = vector.load %arg10[%c1_28, %c1_29, %c0_30] : memref<10x10x16xf32, #tpu.memory_space<vmem>>, vector<8x8x16xf32>
    tpu.vector_store %arg10[%c1_28, %c1_29, %c0_30], %78 {strides = array<i32>} : memref<10x10x16xf32, #tpu.memory_space<vmem>>, vector<8x8x16xf32>,
    %c0_31 = arith.constant 0 : index
    %c0_32 = arith.constant 0 : index
    %c0_33 = arith.constant 0 : index
    %80 = vector.load %arg10[%c0_31, %c0_32, %c0_33] : memref<10x10x16xf32, #tpu.memory_space<vmem>>, vector<10x10x16xf32>
    %81 = vector.extract_strided_slice %80 {offsets = [0, 0, 0], sizes = [8, 8, 16], strides = [1, 1, 1]} : vector<10x10x16xf32> to vector<8x8x16xf32>
    %82 = vector.shape_cast %81 : vector<8x8x16xf32> to vector<64x16xf32>
    %83 = vector.extract_strided_slice %80 {offsets = [0, 1, 0], sizes = [8, 8, 16], strides = [1, 1, 1]} : vector<10x10x16xf32> to vector<8x8x16xf32>
    %84 = vector.shape_cast %83 : vector<8x8x16xf32> to vector<64x16xf32>
    %85 = vector.extract_strided_slice %80 {offsets = [0, 2, 0], sizes = [8, 8, 16], strides = [1, 1, 1]} : vector<10x10x16xf32> to vector<8x8x16xf32>
    %86 = vector.shape_cast %85 : vector<8x8x16xf32> to vector<64x16xf32>
    %87 = vector.extract_strided_slice %80 {offsets = [1, 0, 0], sizes = [8, 8, 16], strides = [1, 1, 1]} : vector<10x10x16xf32> to vector<8x8x16xf32>
    %88 = vector.shape_cast %87 : vector<8x8x16xf32> to vector<64x16xf32>
    %89 = vector.extract_strided_slice %80 {offsets = [1, 1, 0], sizes = [8, 8, 16], strides = [1, 1, 1]} : vector<10x10x16xf32> to vector<8x8x16xf32>
    %90 = vector.shape_cast %89 : vector<8x8x16xf32> to vector<64x16xf32>
    %91 = vector.extract_strided_slice %80 {offsets = [1, 2, 0], sizes = [8, 8, 16], strides = [1, 1, 1]} : vector<10x10x16xf32> to vector<8x8x16xf32>
    %92 = vector.shape_cast %91 : vector<8x8x16xf32> to vector<64x16xf32>
    %93 = vector.extract_strided_slice %80 {offsets = [2, 0, 0], sizes = [8, 8, 16], strides = [1, 1, 1]} : vector<10x10x16xf32> to vector<8x8x16xf32>
    %94 = vector.shape_cast %93 : vector<8x8x16xf32> to vector<64x16xf32>
    %95 = vector.extract_strided_slice %80 {offsets = [2, 1, 0], sizes = [8, 8, 16], strides = [1, 1, 1]} : vector<10x10x16xf32> to vector<8x8x16xf32>
    %96 = vector.shape_cast %95 : vector<8x8x16xf32> to vector<64x16xf32>
    %97 = vector.extract_strided_slice %80 {offsets = [2, 2, 0], sizes = [8, 8, 16], strides = [1, 1, 1]} : vector<10x10x16xf32> to vector<8x8x16xf32>
    %98 = vector.shape_cast %97 : vector<8x8x16xf32> to vector<64x16xf32>
    %99 = tpu.concatenate %82, %84, %86, %88, %90, %92, %94, %96, %98 in 1 : vector<64x16xf32>, vector<64x16xf32>, vector<64x16xf32>, vector<64x16xf32>, vector<64x16xf32>, vector<64x16xf32>, vector<64x16xf32>, vector<64x16xf32>, vector<64x16xf32> -> vector<64x144xf32>
    %c0_34 = arith.constant 0 : index
    %c0_35 = arith.constant 0 : index
    %100 = vector.load %arg6[%c0_34, %c0_35] : memref<144x16xf32, #tpu.memory_space<vmem>>, vector<144x16xf32>
    %cst_36 = arith.constant dense<0.000000e+00> : vector<64x16xf32>
    %101 = tpu.matmul %99, %100, %cst_36 {dimension_numbers = #tpu.dot_dimension_numbers<[1], [0], [0], [1], [0, 0, 1, 1], [], []>} : vector<64x144xf32>, vector<144x16xf32>, vector<64x16xf32> -> vector<64x16xf32>
    %c0_37 = arith.constant 0 : index
    %c0_38 = arith.constant 0 : index
    %102 = vector.load %arg7[%c0_37, %c0_38] : memref<1x16xf32, #tpu.memory_space<vmem>>, vector<1x16xf32>
    %103 = vector.broadcast %102 : vector<1x16xf32> to vector<64x16xf32>
    %104 = arith.addf %101, %103 : vector<64x16xf32>
    %cst_39 = arith.constant 0.000000e+00 : f32
    %105 = vector.broadcast %cst_39 : f32 to vector<64x16xf32>
    %106 = arith.maximumf %104, %105 : vector<64x16xf32>
    %107 = vector.shape_cast %106 : vector<64x16xf32> to vector<1x8x8x16xf32>
    %c0_40 = arith.constant 0 : index
    %c0_41 = arith.constant 0 : index
    %c0_42 = arith.constant 0 : index
    %c0_43 = arith.constant 0 : index
    %108 = vector.load %arg8[%c0_40, %c0_41, %c0_42, %c0_43] : memref<1x8x8x16xf32, #tpu.memory_space<vmem>>, vector<1x8x8x16xf32>
    tpu.vector_store %arg8[%c0_40, %c0_41, %c0_42, %c0_43], %107 {strides = array<i32>} : memref<1x8x8x16xf32, #tpu.memory_space<vmem>>, vector<1x8x8x16xf32>,
    return
  }
  func.func @transform_0(%arg0: i32) -> (i32, i32, i32, i32) {
    %c0_i32 = arith.constant 0 : i32
    %c0_i32_0 = arith.constant 0 : i32
    %c0_i32_1 = arith.constant 0 : i32
    %c0_i32_2 = arith.constant 0 : i32
    return %arg0, %c0_i32, %c0_i32_0, %c0_i32_1 : i32, i32, i32, i32
  }
  func.func @transform_1(%arg0: i32) -> (i32, i32, i32, i32) {
    %c0_i32 = arith.constant 0 : i32
    %c0_i32_0 = arith.constant 0 : i32
    %c0_i32_1 = arith.constant 0 : i32
    %c0_i32_2 = arith.constant 0 : i32
    return %arg0, %c0_i32, %c0_i32_0, %c0_i32_1 : i32, i32, i32, i32
  }
  func.func @transform_2(%arg0: i32) -> (i32, i32) {
    %c0_i32 = arith.constant 0 : i32
    %c0_i32_0 = arith.constant 0 : i32
    %c0_i32_1 = arith.constant 0 : i32
    return %c0_i32, %c0_i32_0 : i32, i32
  }
  func.func @transform_3(%arg0: i32) -> (i32, i32) {
    %c0_i32 = arith.constant 0 : i32
    %c0_i32_0 = arith.constant 0 : i32
    %c0_i32_1 = arith.constant 0 : i32
    return %c0_i32, %c0_i32_0 : i32, i32
  }
  func.func @transform_4(%arg0: i32) -> (i32, i32) {
    %c0_i32 = arith.constant 0 : i32
    %c0_i32_0 = arith.constant 0 : i32
    %c0_i32_1 = arith.constant 0 : i32
    return %c0_i32, %c0_i32_0 : i32, i32
  }
  func.func @transform_5(%arg0: i32) -> (i32, i32) {
    %c0_i32 = arith.constant 0 : i32
    %c0_i32_0 = arith.constant 0 : i32
    %c0_i32_1 = arith.constant 0 : i32
    return %c0_i32, %c0_i32_0 : i32, i32
  }
  func.func @transform_6(%arg0: i32) -> (i32, i32) {
    %c0_i32 = arith.constant 0 : i32
    %c0_i32_0 = arith.constant 0 : i32
    %c0_i32_1 = arith.constant 0 : i32
    return %c0_i32, %c0_i32_0 : i32, i32
  }
  func.func @transform_7(%arg0: i32) -> (i32, i32, i32, i32) {
    %c0_i32 = arith.constant 0 : i32
    %c0_i32_0 = arith.constant 0 : i32
    %c0_i32_1 = arith.constant 0 : i32
    %c0_i32_2 = arith.constant 0 : i32
    return %arg0, %c0_i32, %c0_i32_0, %c0_i32_1 : i32, i32, i32, i32
  }
}

</mosaic_0001>

<bundles_post_ra>
// kernel: tile.13
= control target key start
LH: loop header
LB: loop body
LE: loop exit
PB: predicated region body
PF: predicated region fallthrough
CT: control target
= control target key end

     0   :  { %s22_s0 = inlined_call_operand.vmem [shape: f32[4], index: 0, kind: input, shape index: {}]   ;;  %s23_s1 = inlined_call_operand.vmem [shape: f32[4,4], index: 1, kind: output, shape index: {}]  }
   0x1   :  { %v4_v0 = vld [vmem:[%s22_s0] ss:$0 sm:$0xff] }
   0x2   :  { %5 = vst [vmem:[%s23_s1] sm:$0xf] %v4_v0 }

// kernel: tile.14
= control target key start
LH: loop header
LB: loop body
LE: loop exit
PB: predicated region body
PF: predicated region fallthrough
CT: control target
= control target key end

     0   :  { %s37_s8 = smov 4   ;;  %s38_s9 = smov 8   ;;  %vm7_vm0 = vcmask 31744   ;;  %vm13_vm1 = vcmask 130144   ;;  %vm19_vm2 = vcmask 97344   ;;  %vm25_vm3 = vcmask 64544   ;;  %s55_s0 = inlined_call_operand.vmem [shape: f32[4,4], index: 0, kind: input, shape index: {}]   ;;  %s56_s1 = inlined_call_operand.vmem [shape: f32[1,16], index: 1, kind: output, shape index: {}]  }
   0x1   :  { %v4_v0 = vld [vmem:[%s55_s0] sm:$0xf]  ;;  %s36_s0 = smov 12  }
   0x2   :  { %5 = vst [vmem:[#allocation1] sm:$0xf] %v4_v0 }
   0x9   :  { %v10_v1 = vld [vmem:[#allocation1 + $0x3] sm:$0x1]   ;;  %v22_v2 = vld [vmem:[#allocation1 + $0x1] sm:$0x1]   ;;  %v16_v3 = vld [vmem:[#allocation1 + $0x2] sm:$0x1]  }
   0xa   :  { %11 = vrot.lane.b32.xlu0 %v10_v1, %s36_s0  ;;  %23 = vrot.lane.b32.xlu1 %v22_v2, %s37_s8  ;;  %v6_v4 = vld [vmem:[#allocation1] sm:$0x1]  }
   0xb   :  { %8 = vst.msk [vmem:[#allocation0] sm:$0x1] %vm7_vm0, %v6_v4  }
  0x12   :  { %17 = vrot.lane.b32.xlu0 %v16_v3, %s38_s9 }
  0x7c   :  { %v12_v5 = vpop.permute.xlu0 %11   ;;  %v24_v6 = vpop.permute.xlu1 %23  }
  0x7d   :  { %14 = vst.msk [vmem:[#allocation0] sm:$0x1] %vm13_vm1, %v12_v5  }
  0x84   :  { %v18_v7 = vpop.permute.xlu0 %17  }
  0x85   :  { %20 = vst.msk [vmem:[#allocation0] sm:$0x1] %vm19_vm2, %v18_v7  }
  0x86   :  { %26 = vst.msk [vmem:[#allocation0] sm:$0x1] %vm25_vm3, %v24_v6  }
  0x8d   :  { %v29_v8 = vld [vmem:[#allocation0] sm:$0x1] }
  0x8e   :  { %32 = vst [vmem:[%s56_s1] sm:$0x1] %v29_v8 }

// kernel: up_module_forward.1
= control target key start
LH: loop header
LB: loop body
LE: loop exit
PB: predicated region body
PF: predicated region fallthrough
CT: control target
= control target key end

     0   :  { %s2622_s24 = smov 0   ;;  %s4062_s0 = inlined_call_operand.vmem [shape: f32[2,10,10,16], index: 0, kind: input, shape index: {}]   ;;  %s4063_s1 = inlined_call_operand.vmem [shape: f32[2,10,10,8], index: 1, kind: input, shape index: {}]   ;;  %s4064_s2 = inlined_call_operand.vmem [shape: f32[72,16], index: 2, kind: input, shape index: {}]   ;;  %s4065_s3 = inlined_call_operand.vmem [shape: f32[288,16], index: 3, kind: input, shape index: {}]   ;;  %s4066_s4 = inlined_call_operand.vmem [shape: f32[1,16], index: 4, kind: input, shape index: {}]   ;;  %s4067_s5 = inlined_call_operand.vmem [shape: f32[144,16], index: 5, kind: input, shape index: {}]   ;;  %s4068_s6 = inlined_call_operand.vmem [shape: f32[1,16], index: 6, kind: input, shape index: {}]   ;;  %s4069_s7 = inlined_call_operand.vmem [shape: f32[2,8,8,16], index: 7, kind: output, shape index: {}]  }
   0x1 LB: > { %s2236_s25 = sadd.s32 4294967295, %s2568_s24   ;;  %p2240_p0 = scmp.ge.s32.totalorder %s2568_s24, 1  ;;  %s2568_s24 = sphi %s2622_s24, %s17_s24  }
   0x2   : > { %p247_p1 = scmp.lt.s32.totalorder %s2568_s24, 3 }
   0x4   : > { %p248_p2 = pnand %p2240_p0, %p247_p1 }
   0x5   : > { %p284_p3 = scmp.lt.s32.totalorder (!%p248_p2), %s2236_s25, 1  ;;  %s2570_s30 = smov (!%p248_p2), 8  }
   0x6   : > { %251 = sbr.rel (%p248_p2) target bundleno = 1210 (0x4ba), region = 48  ;;  %s2571_s8 = smov (!%p248_p2), 24  }
   0x7   : > { %s2572_s9 = smov (!%p248_p2), 16   ;;  %s2573_s10 = smov (!%p248_p2), 48  }
   0x8   : > { %s2574_s11 = smov (!%p248_p2), 40   ;;  %s2575_s12 = smov (!%p248_p2), 32  }
   0x9   : > { %s2576_s13 = smov (!%p248_p2), 64   ;;  %s2577_s14 = smov (!%p248_p2), 56  }
   0xb   : > { %s4071_s25 = smov (!%p284_p3, %s2236_s25), 1  ;;  %vm377_vm0 = vcmask 1046528   ;;  %vm402_vm1 = vcmask 1045504   ;;  %v714_v57 = vld [vmem:[%s4064_s2 + $0x40] sm:$0xff]  ;;  %v713_v58 = vld [vmem:[%s4064_s2 + $0x38] sm:$0xff]  ;;  %v712_v60 = vld [vmem:[%s4064_s2 + $0x30] sm:$0xff] }
   0xc   : > { %s2278_s26 = smul.u32 160, %s4071_s25  ;;  %747 = vmatpush.msra.mxu0 %v714_v57  ;;  %v711_v62 = vld [vmem:[%s4064_s2 + $0x28] sm:$0xff]  ;;  %v710_v63 = vld [vmem:[%s4064_s2 + $0x20] sm:$0xff]  ;;  %vm635_vm2 = vcmask 64512   ;;  %vm299_vm3 = vcmask 130048   ;;  %vm652_vm4 = vcmask 195584  }
   0xd   : > { %vm661_vm5 = vcmask 261120   ;;  %vm670_vm6 = vcmask 326656   ;;  %vm679_vm7 = vcmask 392192   ;;  %vm688_vm8 = vcmask 457728   ;;  %s2271_s18 = sshll.u32 %s4071_s25, 6 }
   0xe   : > { %s2638_s29 = scalar_lea.vmem %s4063_s1, %s2278_s26  ;;  %748 = vmatpush.msra.mxu0 %v713_v58  ;;  %vm697_vm9 = vcmask 523264   ;;  %vm715_vm10 = vcmask 588800   ;;  %vm301_vm11 = vcmask 123904   ;;  %vm1098_vm12 = vcmask 654336   ;;  %s4041_s21 = scalar_lea.vmem %s4069_s7, %s2271_s18 }
   0xf   : > { %v2641_v0 = vld [vmem:[%s2638_s29 + $0x40] sm:$0xff]  ;;  %v2644_v1 = vld [vmem:[%s2638_s29 + $0x48] sm:$0x3]  ;;  %v2659_v11 = vld [vmem:[%s2638_s29 + $0x50] sm:$0xff]  ;;  %vm1107_vm13 = vcmask 785408   ;;  %vm1116_vm14 = vcmask 916480  }
  0x10   : > { %v2647_v2 = vld [vmem:[%s2638_s29 + $0x20] sm:$0xff]  ;;  %v390_v3 = vrot.slane %v2641_v0, 1  ;;  %v391_v4 = vrot.slane %v2644_v1, 1  ;;  %v346_v5 = vld [vmem:[%s2638_s29 + $0x28] sm:$0x3]  ;;  %v2668_v15 = vld [vmem:[%s2638_s29 + $0x30] sm:$0xff]  ;;  %749 = vmatpush.msra.mxu0 %v712_v60 }
  0x11   : > { %v384_v6 = vrot.slane %v2647_v2, 1  ;;  %v2654_v7 = vld [vmem:[%s2638_s29] sm:$0xff]  ;;  %v385_v8 = vrot.slane %v346_v5, 1  ;;  %v342_v9 = vld [vmem:[%s2638_s29 + $0x8] sm:$0x3]  ;;  %v2675_v18 = vld [vmem:[%s2638_s29 + $0x10] sm:$0xff] }
  0x12   : > { %v378_v10 = vrot.slane %v2654_v7, 1  ;;  %v2662_v12 = vsel %vm377_vm0, %v390_v3, %v391_v4  ;;  %v379_v13 = vrot.slane %v342_v9, 1  ;;  %v2665_v14 = vld [vmem:[%s2638_s29 + $0x58] sm:$0x3]  ;;  %v393_v21 = vrot.slane %v2659_v11, 1  ;;  %v2693_v30 = vld [vmem:[%s2638_s29 + $0x60] sm:$0xff]  ;;  %750 = vmatpush.msra.mxu0 %v711_v62 }
  0x13   : > { %v348_v16 = vld [vmem:[%s2638_s29 + $0x38] sm:$0x3]  ;;  %451 = vrot.lane.b32.xlu2 %v2662_v12, %s2570_s30  ;;  %v386_v17 = vsel %vm377_vm0, %v384_v6, %v385_v8  ;;  %v394_v22 = vrot.slane %v2665_v14, 1  ;;  %v387_v23 = vrot.slane %v2668_v15, 1  ;;  %v381_v25 = vrot.slane %v2675_v18, 1  ;;  %v708_v3 = vld [vmem:[%s4064_s2 + $0x10] sm:$0xff] }
  0x14   : > { %v344_v19 = vld [vmem:[%s2638_s29 + $0x18] sm:$0x3]  ;;  %447 = vrot.lane.b32.xlu1 %v386_v17, %s2570_s30  ;;  %v380_v20 = vsel %vm377_vm0, %v378_v10, %v379_v13  ;;  %v388_v24 = vrot.slane %v348_v16, 1  ;;  %v2696_v31 = vld [vmem:[%s2638_s29 + $0x68] sm:$0x3]  ;;  %v403_v32 = vrot.slane %v2654_v7, 2  ;;  %751 = vmatpush.msra.mxu0 %v710_v63 }
  0x15   : > { %443 = vrot.lane.b32.xlu0 %v380_v20, %s2570_s30  ;;  %v382_v26 = vrot.slane %v344_v19, 1  ;;  %v2686_v27 = vsel %vm377_vm0, %v393_v21, %v394_v22  ;;  %v404_v33 = vrot.slane %v342_v9, 2  ;;  %v396_v34 = vrot.slane %v2693_v30, 1  ;;  %v2805_v4 = vld [vmem:[%s2638_s29 + $0x70] sm:$0xff]  ;;  %v707_v6 = vld [vmem:[%s4064_s2 + $0x8] sm:$0xff] }
  0x16   : > { %v389_v28 = vsel %vm377_vm0, %v387_v23, %v388_v24  ;;  %v397_v35 = vrot.slane %v2696_v31, 1  ;;  %v406_v38 = vrot.slane %v2675_v18, 2  ;;  %v407_v39 = vrot.slane %v344_v19, 2 }
  0x17   : > { %v383_v29 = vsel %vm377_vm0, %v381_v25, %v382_v26  ;;  %v405_v36 = vsel %vm402_vm1, %v403_v32, %v404_v33  ;;  %v409_v41 = vrot.slane %v2647_v2, 2  ;;  %v410_v42 = vrot.slane %v346_v5, 2  ;;  %v356_v5 = vld [vmem:[%s2638_s29 + $0x78] sm:$0x3] }
  0x18   : > { %v2705_v37 = vsel %vm377_vm0, %v396_v34, %v397_v35  ;;  %v408_v40 = vsel %vm402_vm1, %v406_v38, %v407_v39  ;;  %v412_v44 = vrot.slane %v2668_v15, 2  ;;  %v413_v45 = vrot.slane %v348_v16, 2 }
  0x19   : > { %v411_v43 = vsel %vm402_vm1, %v409_v41, %v410_v42  ;;  %v415_v47 = vrot.slane %v2641_v0, 2  ;;  %v416_v48 = vrot.slane %v2644_v1, 2  ;;  %v418_v50 = vrot.slane %v2659_v11, 2  ;;  %v709_v1 = vld [vmem:[%s4064_s2 + $0x18] sm:$0xff] }
  0x1a   : > { %v414_v46 = vsel %vm402_vm1, %v412_v44, %v413_v45  ;;  %v419_v51 = vrot.slane %v2665_v14, 2  ;;  %v421_v55 = vrot.slane %v2693_v30, 2  ;;  %v422_v56 = vrot.slane %v2696_v31, 2  ;;  %752 = vmatpush.msra.mxu0 %v709_v1  ;;  %v706_v14 = vld [vmem:[%s4064_s2] sm:$0xff] }
  0x1b   : > { %453 = vrot.lane.b32.xlu2 %v2686_v27, %s2570_s30  ;;  %v417_v49 = vsel %vm402_vm1, %v415_v47, %v416_v48  ;;  %v399_v10 = vrot.slane %v2805_v4, 1  ;;  %v424_v19 = vrot.slane %v2805_v4, 2  ;;  %v425_v20 = vrot.slane %v356_v5, 2  ;;  %v359_v48 = vld [vmem:[%s2638_s29 + $0x90] sm:$0xff] }
  0x1c   : > { %449 = vrot.lane.b32.xlu1 %v389_v28, %s2570_s30  ;;  %v420_v52 = vsel %vm402_vm1, %v418_v50, %v419_v51  ;;  %v423_v59 = vsel %vm402_vm1, %v421_v55, %v422_v56  ;;  %753 = vmatpush.msra.mxu0 %v708_v3  ;;  %v437_v50 = vrot.slane %v359_v48, 1  ;;  %v360_v55 = vld [vmem:[%s2638_s29 + $0x98] sm:$0x3]  ;;  %v440_v62 = vrot.slane %v359_v48, 2 }
  0x1d   : > { %445 = vrot.lane.b32.xlu0 %v383_v29, %s2570_s30  ;;  %v426_v23 = vsel %vm402_vm1, %v424_v19, %v425_v20  ;;  %v438_v57 = vrot.slane %v360_v55, 1  ;;  %v441_v63 = vrot.slane %v360_v55, 2 }
  0x1e   : > { %754 = vmatpush.msra.mxu0 %v707_v6 }
  0x1f   : > { %v439_v60 = vsel %vm377_vm0, %v437_v50, %v438_v57 }
  0x20   : > { %755 = vmatpush.msra.mxu0 %v706_v14 }
  0x23   : > { %491 = vrot.lane.b32.xlu2 %v2675_v18, %s2571_s8 }
  0x24   : > { %467 = vrot.lane.b32.xlu1 %v405_v36, %s2572_s9 }
  0x25   : > { %455 = vrot.lane.b32.xlu0 %v2705_v37, %s2570_s30 }
  0x2b   : > { %563 = vrot.lane.b32.xlu2 %v2647_v2, %s2573_s10 }
  0x2c   : > { %539 = vrot.lane.b32.xlu1 %v408_v40, %s2574_s11 }
  0x2d   : > { %515 = vrot.lane.b32.xlu0 %v383_v29, %s2575_s12 }
  0x33   : > { %469 = vrot.lane.b32.xlu2 %v408_v40, %s2572_s9 }
  0x34   : > { %611 = vrot.lane.b32.xlu1 %v411_v43, %s2576_s13 }
  0x35   : > { %587 = vrot.lane.b32.xlu0 %v386_v17, %s2577_s14 }
  0x3b   : > { %541 = vrot.lane.b32.xlu2 %v411_v43, %s2574_s11 }
  0x3c   : > { %517 = vrot.lane.b32.xlu1 %v386_v17, %s2575_s12 }
  0x3d   : > { %493 = vrot.lane.b32.xlu0 %v2647_v2, %s2571_s8 }
  0x43   : > { %613 = vrot.lane.b32.xlu2 %v414_v46, %s2576_s13 }
  0x44   : > { %589 = vrot.lane.b32.xlu1 %v389_v28, %s2577_s14 }
  0x45   : > { %565 = vrot.lane.b32.xlu0 %v2668_v15, %s2573_s10 }
  0x4b   : > { %519 = vrot.lane.b32.xlu2 %v389_v28, %s2575_s12  ;;  %v358_v28 = vld [vmem:[%s2638_s29 + $0x88] sm:$0x3] }
  0x4c   : > { %495 = vrot.lane.b32.xlu1 %v2668_v15, %s2571_s8  ;;  %v433_v33 = vrot.slane %v358_v28, 2  ;;  %v430_v36 = vrot.slane %v358_v28, 1 }
  0x4d   : > { %471 = vrot.lane.b32.xlu0 %v411_v43, %s2572_s9 }
  0x53   : > { %591 = vrot.lane.b32.xlu2 %v2662_v12, %s2577_s14 }
  0x54   : > { %567 = vrot.lane.b32.xlu1 %v2641_v0, %s2573_s10 }
  0x55   : > { %543 = vrot.lane.b32.xlu0 %v414_v46, %s2574_s11 }
  0x5b   : > { %497 = vrot.lane.b32.xlu2 %v2641_v0, %s2571_s8 }
  0x5c   : > { %473 = vrot.lane.b32.xlu1 %v414_v46, %s2572_s9 }
  0x5d   : > { %615 = vrot.lane.b32.xlu0 %v417_v49, %s2576_s13 }
  0x63   : > { %569 = vrot.lane.b32.xlu2 %v2659_v11, %s2573_s10 }
  0x64   : > { %545 = vrot.lane.b32.xlu1 %v417_v49, %s2574_s11 }
  0x65   : > { %521 = vrot.lane.b32.xlu0 %v2662_v12, %s2575_s12  ;;  %v400_v12 = vrot.slane %v356_v5, 1 }
  0x67   : > { %v401_v16 = vsel %vm377_vm0, %v399_v10, %v400_v12  ;;  %v442_v12 = vsel %vm402_vm1, %v440_v62, %v441_v63 }
  0x6b   : > { %475 = vrot.lane.b32.xlu2 %v417_v49, %s2572_s9 }
  0x6c   : > { %617 = vrot.lane.b32.xlu1 %v420_v52, %s2576_s13 }
  0x6d   : > { %593 = vrot.lane.b32.xlu0 %v2686_v27, %s2577_s14  ;;  %v2761_v53 = vpop.permute.xlu2 %451 }
  0x73   : > { %547 = vrot.lane.b32.xlu2 %v420_v52, %s2574_s11 }
  0x74   : > { %523 = vrot.lane.b32.xlu1 %v2686_v27, %s2575_s12  ;;  %v357_v27 = vld [vmem:[%s2638_s29 + $0x80] sm:$0xff] }
  0x75   : > { %499 = vrot.lane.b32.xlu0 %v2659_v11, %s2571_s8  ;;  %v2768_v54 = vpop.permute.xlu2 %453  ;;  %v432_v32 = vrot.slane %v357_v27, 2  ;;  %v429_v35 = vrot.slane %v357_v27, 1 }
  0x77   : > { %v434_v39 = vsel %vm402_vm1, %v432_v32, %v433_v33  ;;  %v431_v40 = vsel %vm377_vm0, %v429_v35, %v430_v36 }
  0x7b   : > { %619 = vrot.lane.b32.xlu2 %v423_v59, %s2576_s13 }
  0x7c   : > { %595 = vrot.lane.b32.xlu1 %v2705_v37, %s2577_s14 }
  0x7d   : > { %571 = vrot.lane.b32.xlu0 %v2693_v30, %s2573_s10  ;;  %v492_v61 = vpop.permute.xlu2 %491 }
  0x83   : > { %525 = vrot.lane.b32.xlu2 %v2705_v37, %s2575_s12 }
  0x84   : > { %501 = vrot.lane.b32.xlu1 %v2693_v30, %s2571_s8 }
  0x85   : > { %477 = vrot.lane.b32.xlu0 %v420_v52, %s2572_s9  ;;  %v564_v9 = vpop.permute.xlu2 %563 }
  0x86   : > { %v2811_v8 = vpop.permute.xlu1 %447 }
  0x87   : > { %v444_v13 = vpop.permute.xlu0 %443 }
  0x88   : > { %v636_v29 = vsel %vm635_vm2, %v2654_v7, %v444_v13 }
  0x8b   : > { %597 = vrot.lane.b32.xlu2 %v401_v16, %s2577_s14 }
  0x8c   : > { %573 = vrot.lane.b32.xlu1 %v2805_v4, %s2573_s10 }
  0x8d   : > { %549 = vrot.lane.b32.xlu0 %v423_v59, %s2574_s11  ;;  %v470_v22 = vpop.permute.xlu2 %469 }
  0x8e   : > { %v2822_v17 = vpop.permute.xlu1 %449 }
  0x8f   : > { %v446_v21 = vpop.permute.xlu0 %445 }
  0x90   : > { %v637_v49 = vsel %vm635_vm2, %v2675_v18, %v446_v21 }
  0x91   : > { %v645_v58 = vsel %vm299_vm3, %v637_v49, %v470_v22 }
  0x93   : > { %503 = vrot.lane.b32.xlu2 %v2805_v4, %s2571_s8 }
  0x94   : > { %479 = vrot.lane.b32.xlu1 %v423_v59, %s2572_s9 }
  0x95   : > { %621 = vrot.lane.b32.xlu0 %v426_v23, %s2576_s13  ;;  %v542_v26 = vpop.permute.xlu2 %541 }
  0x96   : > { %v468_v24 = vpop.permute.xlu1 %467 }
  0x97   : > { %v2830_v25 = vpop.permute.xlu0 %455  ;;  %v644_v31 = vsel %vm299_vm3, %v636_v29, %v468_v24 }
  0x98   : > { %v653_v38 = vsel %vm652_vm4, %v644_v31, %v492_v61 }
  0x9b   : > { %575 = vrot.lane.b32.xlu2 %v357_v27, %s2573_s10 }
  0x9c   : > { %551 = vrot.lane.b32.xlu1 %v426_v23, %s2574_s11 }
  0x9d   : > { %527 = vrot.lane.b32.xlu0 %v401_v16, %s2575_s12  ;;  %v614_v41 = vpop.permute.xlu2 %613 }
  0x9e   : > { %v540_v34 = vpop.permute.xlu1 %539 }
  0x9f   : > { %v516_v37 = vpop.permute.xlu0 %515 }
  0xa0   : > { %v662_v7 = vsel %vm661_vm5, %v653_v38, %v516_v37 }
  0xa1   : > { %v671_v42 = vsel %vm670_vm6, %v662_v7, %v540_v34 }
  0xa2   : > { %v680_v44 = vsel %vm679_vm7, %v671_v42, %v564_v9 }
  0xa3   : > { %457 = vrot.lane.b32.xlu2 %v401_v16, %s2570_s30  ;;  %v638_v16 = vsel %vm635_vm2, %v2647_v2, %v2811_v8  ;;  %v639_v8 = vsel %vm635_vm2, %v2668_v15, %v2822_v17 }
  0xa4   : > { %623 = vrot.lane.b32.xlu1 %v434_v39, %s2576_s13 }
  0xa5   : > { %599 = vrot.lane.b32.xlu0 %v431_v40, %s2577_s14  ;;  %v520_v51 = vpop.permute.xlu2 %519 }
  0xa6   : > { %v612_v43 = vpop.permute.xlu1 %611 }
  0xa7   : > { %v588_v45 = vpop.permute.xlu0 %587 }
  0xa8   : > { %v689_v46 = vsel %vm688_vm8, %v680_v44, %v588_v45  ;;  %v640_v44 = vsel %vm635_vm2, %v2641_v0, %v2761_v53 }
  0xa9   : > { %v698_v47 = vsel %vm697_vm9, %v689_v46, %v612_v43 }
  0xaa   : > { %2245 = vmatmul.msk.f32.vlgmr.msra.gmra.mxu0 %vm715_vm10, %v698_v47 }
  0xab   : > { %529 = vrot.lane.b32.xlu2 %v431_v40, %s2575_s12 }
  0xac   : > { %505 = vrot.lane.b32.xlu1 %v357_v27, %s2571_s8  ;;  %s2914_s8 = scalar_lea.vmem %s4062_s0, %s2278_s26  ;;  %s2579_s26 = smov 80  }
  0xad   : > { %481 = vrot.lane.b32.xlu0 %v426_v23, %s2572_s9  ;;  %v592_v5 = vpop.permute.xlu2 %591  ;;  %v2925_v62 = vld [vmem:[%s2914_s8 + $0x30] sm:$0xff] }
  0xae   : > { %v518_v52 = vpop.permute.xlu1 %517 }
  0xaf   : > { %v494_v56 = vpop.permute.xlu0 %493 }
  0xb0   : > { %v654_v59 = vsel %vm652_vm4, %v645_v58, %v494_v56 }
  0xb1   : > { %v663_v61 = vsel %vm661_vm5, %v654_v59, %v518_v52  ;;  %v641_v59 = vsel %vm635_vm2, %v2659_v11, %v2768_v54  ;;  %v2919_v11 = vld [vmem:[%s2914_s8 + $0x20] sm:$0xff]  ;;  %v2922_v54 = vld [vmem:[%s2914_s8 + $0x28] sm:$0x3] }
  0xb2   : > { %v672_v1 = vsel %vm670_vm6, %v663_v61, %v542_v26 }
  0xb3   : > { %601 = vrot.lane.b32.xlu2 %v439_v60, %s2577_s14  ;;  %s2581_s14 = smov 112  }
  0xb4   : > { %577 = vrot.lane.b32.xlu1 %v359_v48, %s2573_s10 }
  0xb5   : > { %553 = vrot.lane.b32.xlu0 %v434_v39, %s2574_s11  ;;  %v498_v19 = vpop.permute.xlu2 %497  ;;  %s2580_s11 = smov 96  }
  0xb6   : > { %v590_v18 = vpop.permute.xlu1 %589 }
  0xb7   : > { %v566_v3 = vpop.permute.xlu0 %565 }
  0xb8   : > { %v681_v6 = vsel %vm679_vm7, %v672_v1, %v566_v3  ;;  %v2928_v1 = vld [vmem:[%s2914_s8 + $0x38] sm:$0x3]  ;;  %v832_v3 = vrot.slane %v2919_v11, 1 }
  0xb9   : > { %v690_v9 = vsel %vm688_vm8, %v681_v6, %v590_v18  ;;  %v835_v6 = vrot.slane %v2925_v62, 1 }
  0xba   : > { %v699_v10 = vsel %vm697_vm9, %v690_v9, %v614_v41  ;;  %v2934_v9 = vld [vmem:[%s2914_s8] sm:$0xff] }
  0xbb   : > { %2246 = vmatmul.msk.f32.gmra.mxu0 %vm715_vm10, %v699_v10 }
  0xbd   : > { %625 = vrot.lane.b32.xlu0 %v442_v12, %s2576_s13  ;;  %v570_v27 = vpop.permute.xlu2 %569  ;;  %v836_v12 = vrot.slane %v2928_v1, 1 }
  0xbe   : > { %v496_v13 = vpop.permute.xlu1 %495 }
  0xbf   : > { %v472_v14 = vpop.permute.xlu0 %471 }
  0xc0   : > { %v646_v20 = vsel %vm299_vm3, %v638_v16, %v472_v14  ;;  %v2941_v14 = vld [vmem:[%s2914_s8 + $0x10] sm:$0xff]  ;;  %v2944_v16 = vld [vmem:[%s2914_s8 + $0x18] sm:$0x3] }
  0xc1   : > { %v655_v21 = vsel %vm652_vm4, %v646_v20, %v496_v13  ;;  %v2938_v13 = vld [vmem:[%s2914_s8 + $0x8] sm:$0x3] }
  0xc2   : > { %v664_v24 = vsel %vm661_vm5, %v655_v21, %v520_v51  ;;  %v826_v21 = vrot.slane %v2934_v9, 1 }
  0xc5   : > { %v476_v34 = vpop.permute.xlu2 %475 }
  0xc6   : > { %v568_v22 = vpop.permute.xlu1 %567  ;;  %v648_v46 = vsel %vm299_vm3, %v640_v44, %v476_v34  ;;  %v2978_v34 = vld [vmem:[%s2914_s8 + $0x58] sm:$0x3] }
  0xc7   : > { %v544_v23 = vpop.permute.xlu0 %543 }
  0xc8   : > { %v673_v26 = vsel %vm670_vm6, %v664_v24, %v544_v23  ;;  %v2954_v24 = vsel %vm377_vm0, %v835_v6, %v836_v12 }
  0xc9   : > { %v682_v28 = vsel %vm679_vm7, %v673_v26, %v568_v22  ;;  %v827_v22 = vrot.slane %v2938_v13, 1  ;;  %v829_v26 = vrot.slane %v2941_v14, 1 }
  0xca   : > { %v691_v32 = vsel %vm688_vm8, %v682_v28, %v592_v5  ;;  %v833_v5 = vrot.slane %v2922_v54, 1 }
  0xcc   : > { %v2948_v20 = vsel %vm377_vm0, %v832_v3, %v833_v5 }
  0xcd   : > { %v548_v40 = vpop.permute.xlu2 %547  ;;  %v2960_v28 = vpack.i.bf16 %v2954_v24, %v2948_v20 }
  0xce   : > { %v474_v29 = vpop.permute.xlu1 %473 }
  0xcf   : > { %v616_v31 = vpop.permute.xlu0 %615  ;;  %v647_v33 = vsel %vm299_vm3, %v639_v8, %v474_v29  ;;  %v828_v29 = vsel %vm377_vm0, %v826_v21, %v827_v22  ;;  %2305 = vrot.lane.b32.xlu2 %v2960_v28, %s2572_s9 }
  0xd0   : > { %v700_v2 = vsel %vm697_vm9, %v691_v32, %v616_v31  ;;  %v656_v37 = vsel %vm652_vm4, %v647_v33, %v498_v19  ;;  %v2964_v31 = vld [vmem:[%s2914_s8 + $0x40] sm:$0xff]  ;;  %v2967_v32 = vld [vmem:[%s2914_s8 + $0x48] sm:$0x3]  ;;  %v2578_v33 = vmov 0.0  }
  0xd1   : > { %2247 = vmatmul.msk.f32.gmra.mxu0 %vm715_vm10, %v700_v2  ;;  %v2970_v2 = vld [vmem:[%s2914_s8 + $0x50] sm:$0xff]  ;;  %303 = vst.msk [vmem:[#allocation2 + $0x10] sm:$0xff] %vm299_vm3, %v2578_v33 }
  0xd2   : > { %304 = vst.msk [vmem:[#allocation2 + $0x18] sm:$0x3] %vm301_vm11, %v2578_v33 }
  0xd3   : > { %300 = vst.msk [vmem:[#allocation2] sm:$0xff] %vm299_vm3, %v2578_v33 }
  0xd4   : > { %302 = vst.msk [vmem:[#allocation2 + $0x8] sm:$0x3] %vm301_vm11, %v2578_v33 }
  0xd5   : > { %v620_v47 = vpop.permute.xlu2 %619  ;;  %305 = vst.msk [vmem:[#allocation2 + $0x20] sm:$0xff] %vm299_vm3, %v2578_v33 }
  0xd6   : > { %v546_v35 = vpop.permute.xlu1 %545  ;;  %306 = vst.msk [vmem:[#allocation2 + $0x28] sm:$0x3] %vm301_vm11, %v2578_v33 }
  0xd7   : > { %v522_v36 = vpop.permute.xlu0 %521  ;;  %307 = vst.msk [vmem:[#allocation2 + $0x30] sm:$0xff] %vm299_vm3, %v2578_v33 }
  0xd8   : > { %v665_v38 = vsel %vm661_vm5, %v656_v37, %v522_v36  ;;  %v839_v36 = vrot.slane %v2967_v32, 1  ;;  %308 = vst.msk [vmem:[#allocation2 + $0x38] sm:$0x3] %vm301_vm11, %v2578_v33 }
  0xd9   : > { %v674_v7 = vsel %vm670_vm6, %v665_v38, %v546_v35  ;;  %v838_v35 = vrot.slane %v2964_v31, 1  ;;  %309 = vst.msk [vmem:[#allocation2 + $0x40] sm:$0xff] %vm299_vm3, %v2578_v33 }
  0xda   : > { %v683_v41 = vsel %vm679_vm7, %v674_v7, %v570_v27  ;;  %v830_v27 = vrot.slane %v2944_v16, 1  ;;  %v841_v7 = vrot.slane %v2970_v2, 1  ;;  %310 = vst.msk [vmem:[#allocation2 + $0x48] sm:$0x3] %vm301_vm11, %v2578_v33 }
  0xdb   : > { %311 = vst.msk [vmem:[#allocation2 + $0x50] sm:$0xff] %vm299_vm3, %v2578_v33 }
  0xdc   : > { %v2973_v8 = vsel %vm377_vm0, %v829_v26, %v830_v27  ;;  %312 = vst.msk [vmem:[#allocation2 + $0x58] sm:$0x3] %vm301_vm11, %v2578_v33 }
  0xdd   : > { %v526_v0 = vpop.permute.xlu2 %525  ;;  %v2299_v38 = vpack.i.bf16 %v2973_v8, %v828_v29  ;;  %313 = vst.msk [vmem:[#allocation2 + $0x60] sm:$0xff] %vm299_vm3, %v2578_v33 }
  0xde   : > { %v618_v39 = vpop.permute.xlu1 %617  ;;  %314 = vst.msk [vmem:[#allocation2 + $0x68] sm:$0x3] %vm301_vm11, %v2578_v33 }
  0xdf   : > { %v594_v42 = vpop.permute.xlu0 %593  ;;  %2300 = vrot.lane.b32.xlu1 %v2299_v38, %s2572_s9  ;;  %315 = vst.msk [vmem:[#allocation2 + $0x70] sm:$0xff] %vm299_vm3, %v2578_v33 }
  0xe0   : > { %v692_v43 = vsel %vm688_vm8, %v683_v41, %v594_v42  ;;  %316 = vst.msk [vmem:[#allocation2 + $0x78] sm:$0x3] %vm301_vm11, %v2578_v33 }
  0xe1   : > { %v701_v15 = vsel %vm697_vm9, %v692_v43, %v618_v39  ;;  %v842_v39 = vrot.slane %v2978_v34, 1  ;;  %317 = vst.msk [vmem:[#allocation2 + $0x80] sm:$0xff] %vm299_vm3, %v2578_v33 }
  0xe2   : > { %2248 = vmatmul.msk.f32.gmra.mxu0 %vm715_vm10, %v701_v15  ;;  %318 = vst.msk [vmem:[#allocation2 + $0x88] sm:$0x3] %vm301_vm11, %v2578_v33 }
  0xe3   : > { %v2999_v43 = vsel %vm377_vm0, %v841_v7, %v842_v39  ;;  %319 = vst.msk [vmem:[#allocation2 + $0x90] sm:$0xff] %vm299_vm3, %v2578_v33 }
  0xe4   : > { %320 = vst.msk [vmem:[#allocation2 + $0x98] sm:$0x3] %vm301_vm11, %v2578_v33 }
  0xe5   : > { %v598_v61 = vpop.permute.xlu2 %597  ;;  %321 = vst.msk [vmem:[#allocation3] sm:$0xff] %vm299_vm3, %v2578_v33 }
  0xe6   : > { %v524_v17 = vpop.permute.xlu1 %523  ;;  %322 = vst.msk [vmem:[#allocation3 + $0x8] sm:$0x3] %vm301_vm11, %v2578_v33 }
  0xe7   : > { %v500_v45 = vpop.permute.xlu0 %499  ;;  %323 = vst.msk [vmem:[#allocation3 + $0x10] sm:$0xff] %vm299_vm3, %v2578_v33 }
  0xe8   : > { %v657_v48 = vsel %vm652_vm4, %v648_v46, %v500_v45  ;;  %v642_v46 = vsel %vm635_vm2, %v2693_v30, %v2830_v25  ;;  %324 = vst.msk [vmem:[#allocation3 + $0x18] sm:$0x3] %vm301_vm11, %v2578_v33 }
  0xe9   : > { %v666_v49 = vsel %vm661_vm5, %v657_v48, %v524_v17  ;;  %325 = vst.msk [vmem:[#allocation3 + $0x20] sm:$0xff] %vm299_vm3, %v2578_v33 }
  0xea   : > { %v675_v51 = vsel %vm670_vm6, %v666_v49, %v548_v40  ;;  %v2993_v40 = vsel %vm377_vm0, %v838_v35, %v839_v36  ;;  %v1126_v49 = vld [vmem:[#allocation2 + $0x8] sm:$0x3]  ;;  %326 = vst.msk [vmem:[#allocation3 + $0x28] sm:$0x3] %vm301_vm11, %v2578_v33 }
  0xeb   : > { %v3006_v44 = vpack.i.bf16 %v2999_v43, %v2993_v40  ;;  %v1186_v30 = vrot.slane %v1126_v49, 2  ;;  %v1162_v25 = vrot.slane %v1126_v49, 1  ;;  %327 = vst.msk [vmem:[#allocation3 + $0x30] sm:$0xff] %vm299_vm3, %v2578_v33 }
  0xec   : > { %328 = vst.msk [vmem:[#allocation3 + $0x38] sm:$0x3] %vm301_vm11, %v2578_v33 }
  0xed   : > { %v504_v42 = vpop.permute.xlu2 %503  ;;  %2310 = vrot.lane.b32.xlu0 %v3006_v44, %s2572_s9  ;;  %329 = vst.msk [vmem:[#allocation3 + $0x40] sm:$0xff] %vm299_vm3, %v2578_v33 }
  0xee   : > { %v596_v50 = vpop.permute.xlu1 %595  ;;  %330 = vst.msk [vmem:[#allocation3 + $0x48] sm:$0x3] %vm301_vm11, %v2578_v33 }
  0xef   : > { %v572_v52 = vpop.permute.xlu0 %571  ;;  %331 = vst.msk [vmem:[#allocation3 + $0x50] sm:$0xff] %vm299_vm3, %v2578_v33 }
  0xf0   : > { %v684_v55 = vsel %vm679_vm7, %v675_v51, %v572_v52  ;;  %332 = vst.msk [vmem:[#allocation3 + $0x58] sm:$0x3] %vm301_vm11, %v2578_v33 }
  0xf1   : > { %v693_v56 = vsel %vm688_vm8, %v684_v55, %v596_v50  ;;  %333 = vst.msk [vmem:[#allocation3 + $0x60] sm:$0xff] %vm299_vm3, %v2578_v33 }
  0xf2   : > { %v702_v57 = vsel %vm697_vm9, %v693_v56, %v620_v47  ;;  %v3025_v47 = vld [vmem:[#allocation2] sm:$0xff]  ;;  %334 = vst.msk [vmem:[#allocation3 + $0x68] sm:$0x3] %vm301_vm11, %v2578_v33 }
  0xf3   : > { %2249 = vmatmul.msk.f32.gmra.mxu0 %vm715_vm10, %v702_v57  ;;  %v1185_v50 = vrot.slane %v3025_v47, 2  ;;  %v1161_v51 = vrot.slane %v3025_v47, 1  ;;  %335 = vst.msk [vmem:[#allocation3 + $0x70] sm:$0xff] %vm299_vm3, %v2578_v33 }
  0xf4   : > { %336 = vst.msk [vmem:[#allocation3 + $0x78] sm:$0x3] %vm301_vm11, %v2578_v33 }
  0xf5   : > { %v576_v57 = vpop.permute.xlu2 %575  ;;  %337 = vst.msk [vmem:[#allocation3 + $0x80] sm:$0xff] %vm299_vm3, %v2578_v33 }
  0xf6   : > { %v502_v53 = vpop.permute.xlu1 %501  ;;  %338 = vst.msk [vmem:[#allocation3 + $0x88] sm:$0x3] %vm301_vm11, %v2578_v33 }
  0xf7   : > { %v478_v58 = vpop.permute.xlu0 %477  ;;  %339 = vst.msk [vmem:[#allocation3 + $0x90] sm:$0xff] %vm299_vm3, %v2578_v33 }
  0xf8   : > { %v649_v60 = vsel %vm299_vm3, %v641_v59, %v478_v58  ;;  %340 = vst.msk [vmem:[#allocation3 + $0x98] sm:$0x3] %vm301_vm11, %v2578_v33 }
  0xf9   : > { %v658_v18 = vsel %vm652_vm4, %v649_v60, %v502_v53  ;;  %v1163_v53 = vsel %vm377_vm0, %v1161_v51, %v1162_v25 }
  0xfa   : > { %v667_v19 = vsel %vm661_vm5, %v658_v18, %v526_v0  ;;  %v1187_v0 = vsel %vm402_vm1, %v1185_v50, %v1186_v30  ;;  %1225 = vrot.lane.b32.xlu1 %v1163_v53, %s2572_s9 }
  0xfb   : > { %1249 = vrot.lane.b32.xlu2 %v1187_v0, %s2575_s12 }
  0xfd   : > { %v458_v3 = vpop.permute.xlu2 %457 }
  0xfe   : > { %v574_v63 = vpop.permute.xlu1 %573  ;;  %v643_v6 = vsel %vm635_vm2, %v2805_v4, %v458_v3 }
  0xff   : > { %v550_v10 = vpop.permute.xlu0 %549 }
 0x100   : > { %v676_v23 = vsel %vm670_vm6, %v667_v19, %v550_v10 }
 0x101   : > { %v685_v37 = vsel %vm679_vm7, %v676_v23, %v574_v63 }
 0x102   : > { %v694_v15 = vsel %vm688_vm8, %v685_v37, %v598_v61 }
 0x105   : > { %v530_v4 = vpop.permute.xlu2 %529 }
 0x106   : > { %v480_v41 = vpop.permute.xlu1 %479 }
 0x107   : > { %v622_v17 = vpop.permute.xlu0 %621  ;;  %v650_v48 = vsel %vm299_vm3, %v642_v46, %v480_v41 }
 0x108   : > { %v703_v45 = vsel %vm697_vm9, %v694_v15, %v622_v17  ;;  %v659_v56 = vsel %vm652_vm4, %v650_v48, %v504_v42 }
 0x109   : > { %2250 = vmatmul.msk.f32.gmra.mxu0 %vm715_vm10, %v703_v45 }
 0x10d   : > { %v602_v36 = vpop.permute.xlu2 %601 }
 0x10e   : > { %v552_v52 = vpop.permute.xlu1 %551 }
 0x10f   : > { %v528_v55 = vpop.permute.xlu0 %527 }
 0x110   : > { %v668_v58 = vsel %vm661_vm5, %v659_v56, %v528_v55 }
 0x111   : > { %v677_v59 = vsel %vm670_vm6, %v668_v58, %v552_v52 }
 0x112   : > { %v686_v61 = vsel %vm679_vm7, %v677_v59, %v576_v57 }
 0x116   : > { %v624_v60 = vpop.permute.xlu1 %623 }
 0x117   : > { %v600_v18 = vpop.permute.xlu0 %599 }
 0x118   : > { %v695_v63 = vsel %vm688_vm8, %v686_v61, %v600_v18 }
 0x119   : > { %v704_v5 = vsel %vm697_vm9, %v695_v63, %v624_v60 }
 0x11a   : > { %2251 = vmatmul.msk.f32.gmra.mxu0 %vm715_vm10, %v704_v5 }
 0x11e   : > { %v506_v12 = vpop.permute.xlu1 %505 }
 0x11f   : > { %v482_v10 = vpop.permute.xlu0 %481 }
 0x120   : > { %v651_v19 = vsel %vm299_vm3, %v643_v6, %v482_v10 }
 0x121   : > { %v660_v21 = vsel %vm652_vm4, %v651_v19, %v506_v12 }
 0x122   : > { %v669_v22 = vsel %vm661_vm5, %v660_v21, %v530_v4 }
 0x126   : > { %v578_v29 = vpop.permute.xlu1 %577 }
 0x127   : > { %v757_v23 = vpop.f32.mrf.mxu0  ;;  %v554_v26 = vpop.permute.xlu0 %553 }
 0x128   : > { %782 = vst.msk [vmem:[#allocation2 + $0x11] sm:$0xff] %vm299_vm3, %v757_v23  ;;  %v678_v27 = vsel %vm670_vm6, %v669_v22, %v554_v26 }
 0x129   : > { %v687_v35 = vsel %vm679_vm7, %v678_v27, %v578_v29 }
 0x12a   : > { %v696_v37 = vsel %vm688_vm8, %v687_v35, %v602_v36 }
 0x12f   : > { %v626_v38 = vpop.permute.xlu0 %625  ;;  %v3110_v7 = vld [vmem:[#allocation2 + $0x10] sm:$0xff]  ;;  %v1128_v39 = vld [vmem:[#allocation2 + $0x18] sm:$0x3] }
 0x130   : > { %1273 = vrot.lane.b32.xlu0 %v3110_v7, %s2573_s10  ;;  %v705_v41 = vsel %vm697_vm9, %v696_v37, %v626_v38  ;;  %v1188_v42 = vrot.slane %v3110_v7, 2  ;;  %v1189_v15 = vrot.slane %v1128_v39, 2  ;;  %v1164_v17 = vrot.slane %v3110_v7, 1  ;;  %v3193_v37 = vpop.permute.xlu2 %2305 }
 0x131   : > { %2252 = vmatmul.msk.f32.gmra.mxu0 %vm715_vm10, %v705_v41  ;;  %v1165_v33 = vrot.slane %v1128_v39, 1 }
 0x132   : > { %v1190_v45 = vsel %vm402_vm1, %v1188_v42, %v1189_v15 }
 0x133   : > { %1321 = vrot.lane.b32.xlu2 %v1190_v45, %s2579_s26  ;;  %v1166_v46 = vsel %vm377_vm0, %v1164_v17, %v1165_v33 }
 0x134   : > { %1297 = vrot.lane.b32.xlu1 %v1166_v46, %s2576_s13 }
 0x138   : > { %v760_v48 = vpop.f32.mrf.mxu0  ;;  %1251 = vrot.lane.b32.xlu0 %v1190_v45, %s2575_s12 }
 0x139   : > { %783 = vst.msk [vmem:[#allocation2 + $0x21] sm:$0xff] %vm299_vm3, %v760_v48 }
 0x13b   : > { %1227 = vrot.lane.b32.xlu2 %v1166_v46, %s2572_s9 }
 0x140   : > { %v3125_v49 = vld [vmem:[#allocation2 + $0x20] sm:$0xff]  ;;  %v1130_v50 = vld [vmem:[#allocation2 + $0x28] sm:$0x3] }
 0x141   : > { %1345 = vrot.lane.b32.xlu0 %v3125_v49, %s2580_s11  ;;  %1275 = vrot.lane.b32.xlu1 %v3125_v49, %s2573_s10  ;;  %v1167_v51 = vrot.slane %v3125_v49, 1  ;;  %v1168_v52 = vrot.slane %v1130_v50, 1  ;;  %v1191_v25 = vrot.slane %v3125_v49, 2  ;;  %v1192_v55 = vrot.slane %v1130_v50, 2 }
 0x143   : > { %v1169_v30 = vsel %vm377_vm0, %v1167_v51, %v1168_v52  ;;  %v3136_v56 = vsel %vm402_vm1, %v1191_v25, %v1192_v55 }
 0x144   : > { %1299 = vrot.lane.b32.xlu2 %v1169_v30, %s2576_s13 }
 0x149   : > { %1323 = vrot.lane.b32.xlu0 %v3136_v56, %s2579_s26  ;;  %1369 = vrot.lane.b32.xlu1 %v1169_v30, %s2581_s14 }
 0x14e   : > { %v763_v57 = vpop.f32.mrf.mxu0 }
 0x14f   : > { %784 = vst.msk [vmem:[#allocation2 + $0x31] sm:$0xff] %vm299_vm3, %v763_v57 }
 0x151   : > { %1229 = vrot.lane.b32.xlu0 %v1169_v30, %s2572_s9  ;;  %1253 = vrot.lane.b32.xlu1 %v3136_v56, %s2575_s12  ;;  %v3216_v30 = vpop.permute.xlu1 %2300 }
 0x155   : > { %v1250_v15 = vpop.permute.xlu2 %1249 }
 0x156   : > { %v3145_v0 = vld [vmem:[#allocation2 + $0x30] sm:$0xff]  ;;  %v1132_v53 = vld [vmem:[#allocation2 + $0x38] sm:$0x3] }
 0x157   : > { %1277 = vrot.lane.b32.xlu2 %v3145_v0, %s2573_s10  ;;  %v1170_v58 = vrot.slane %v3145_v0, 1  ;;  %v1171_v59 = vrot.slane %v1132_v53, 1  ;;  %v1194_v61 = vrot.slane %v3145_v0, 2  ;;  %v1195_v18 = vrot.slane %v1132_v53, 2 }
 0x159   : > { %1347 = vrot.lane.b32.xlu1 %v3145_v0, %s2580_s11  ;;  %v1172_v60 = vsel %vm377_vm0, %v1170_v58, %v1171_v59  ;;  %v3158_v3 = vsel %vm402_vm1, %v1194_v61, %v1195_v18 }
 0x15a   : > { %1301 = vrot.lane.b32.xlu0 %v1172_v60, %s2576_s13 }
 0x15f   : > { %v766_v63 = vpop.f32.mrf.mxu0  ;;  %1371 = vrot.lane.b32.xlu2 %v1172_v60, %s2581_s14  ;;  %v3224_v57 = vpop.permute.xlu0 %2310 }
 0x160   : > { %785 = vst.msk [vmem:[#allocation2 + $0x41] sm:$0xff] %vm299_vm3, %v766_v63 }
 0x161   : > { %1325 = vrot.lane.b32.xlu1 %v3158_v3, %s2579_s26 }
 0x167   : > { %1255 = vrot.lane.b32.xlu2 %v3158_v3, %s2575_s12  ;;  %v3164_v5 = vld [vmem:[#allocation2 + $0x40] sm:$0xff]  ;;  %v1134_v6 = vld [vmem:[#allocation2 + $0x48] sm:$0x3] }
 0x168   : > { %1279 = vrot.lane.b32.xlu0 %v3164_v5, %s2573_s10  ;;  %v1173_v10 = vrot.slane %v3164_v5, 1  ;;  %v1174_v12 = vrot.slane %v1134_v6, 1  ;;  %v1197_v21 = vrot.slane %v3164_v5, 2  ;;  %v1198_v22 = vrot.slane %v1134_v6, 2 }
 0x169   : > { %1231 = vrot.lane.b32.xlu1 %v1172_v60, %s2572_s9 }
 0x16a   : > { %v1175_v19 = vsel %vm377_vm0, %v1173_v10, %v1174_v12  ;;  %v3178_v23 = vsel %vm402_vm1, %v1197_v21, %v1198_v22 }
 0x16c   : > { %v1226_v60 = vpop.permute.xlu1 %1225 }
 0x16f   : > { %1349 = vrot.lane.b32.xlu2 %v3164_v5, %s2580_s11 }
 0x170   : > { %v769_v4 = vpop.f32.mrf.mxu0  ;;  %1373 = vrot.lane.b32.xlu0 %v1175_v19, %s2581_s14 }
 0x171   : > { %786 = vst.msk [vmem:[#allocation2 + $0x51] sm:$0xff] %vm299_vm3, %v769_v4  ;;  %1303 = vrot.lane.b32.xlu1 %v1175_v19, %s2576_s13 }
 0x177   : > { %1327 = vrot.lane.b32.xlu2 %v3178_v23, %s2579_s26 }
 0x178   : > { %1257 = vrot.lane.b32.xlu0 %v3178_v23, %s2575_s12  ;;  %v3184_v26 = vld [vmem:[#allocation2 + $0x50] sm:$0xff]  ;;  %v1136_v27 = vld [vmem:[#allocation2 + $0x58] sm:$0x3] }
 0x179   : > { %1281 = vrot.lane.b32.xlu1 %v3184_v26, %s2573_s10  ;;  %v1176_v29 = vrot.slane %v3184_v26, 1  ;;  %v1177_v35 = vrot.slane %v1136_v27, 1  ;;  %v1200_v38 = vrot.slane %v3184_v26, 2  ;;  %v1201_v39 = vrot.slane %v1136_v27, 2 }
 0x17b   : > { %v1178_v36 = vsel %vm377_vm0, %v1176_v29, %v1177_v35  ;;  %v3200_v42 = vsel %vm402_vm1, %v1200_v38, %v1201_v39  ;;  %v1393_v35 = vsel %vm299_vm3, %v3025_v47, %v1226_v60 }
 0x17c   : > { %v1401_v39 = vsel %vm661_vm5, %v1393_v35, %v1250_v15 }
 0x17f   : > { %1233 = vrot.lane.b32.xlu2 %v1175_v19, %s2572_s9 }
 0x180   : > { %1351 = vrot.lane.b32.xlu0 %v3184_v26, %s2580_s11 }
 0x181   : > { %1375 = vrot.lane.b32.xlu1 %v1178_v36, %s2581_s14 }
 0x186   : > { %v772_v41 = vpop.f32.mrf.mxu0 }
 0x187   : > { %787 = vst.msk [vmem:[#allocation2 + $0x61] sm:$0xff] %vm299_vm3, %v772_v41  ;;  %1305 = vrot.lane.b32.xlu2 %v1178_v36, %s2576_s13 }
 0x188   : > { %1329 = vrot.lane.b32.xlu0 %v3200_v42, %s2579_s26 }
 0x189   : > { %1259 = vrot.lane.b32.xlu1 %v3200_v42, %s2575_s12 }
 0x18d   : > { %v1322_v51 = vpop.permute.xlu2 %1321 }
 0x18e   : > { %v3206_v17 = vld [vmem:[#allocation2 + $0x60] sm:$0xff]  ;;  %v1138_v33 = vld [vmem:[#allocation2 + $0x68] sm:$0x3] }
 0x18f   : > { %1283 = vrot.lane.b32.xlu2 %v3206_v17, %s2573_s10  ;;  %v1179_v45 = vrot.slane %v3206_v17, 1  ;;  %v1180_v46 = vrot.slane %v1138_v33, 1  ;;  %v1203_v48 = vrot.slane %v3206_v17, 2  ;;  %v1204_v50 = vrot.slane %v1138_v33, 2 }
 0x190   : > { %1235 = vrot.lane.b32.xlu0 %v1178_v36, %s2572_s9 }
 0x191   : > { %1353 = vrot.lane.b32.xlu1 %v3206_v17, %s2580_s11  ;;  %v1181_v52 = vsel %vm377_vm0, %v1179_v45, %v1180_v46  ;;  %v3222_v55 = vsel %vm402_vm1, %v1203_v48, %v1204_v50 }
 0x195   : > { %v1228_v53 = vpop.permute.xlu2 %1227 }
 0x197   : > { %v775_v25 = vpop.f32.mrf.mxu0  ;;  %1377 = vrot.lane.b32.xlu2 %v1181_v52, %s2581_s14 }
 0x198   : > { %788 = vst.msk [vmem:[#allocation2 + $0x71] sm:$0xff] %vm299_vm3, %v775_v25  ;;  %1307 = vrot.lane.b32.xlu0 %v1181_v52, %s2576_s13 }
 0x199   : > { %1331 = vrot.lane.b32.xlu1 %v3222_v55, %s2579_s26 }
 0x19e   : > { %v1300_v10 = vpop.permute.xlu2 %1299 }
 0x19f   : > { %1237 = vrot.lane.b32.xlu2 %v1181_v52, %s2572_s9  ;;  %v3229_v58 = vld [vmem:[#allocation2 + $0x70] sm:$0xff]  ;;  %v1140_v59 = vld [vmem:[#allocation2 + $0x78] sm:$0x3] }
 0x1a0   : > { %1261 = vrot.lane.b32.xlu0 %v3222_v55, %s2575_s12  ;;  %v1182_v18 = vrot.slane %v3229_v58, 1  ;;  %v1183_v63 = vrot.slane %v1140_v59, 1  ;;  %v1206_v4 = vrot.slane %v3229_v58, 2  ;;  %v1207_v21 = vrot.slane %v1140_v59, 2 }
 0x1a1   : > { %1285 = vrot.lane.b32.xlu1 %v3229_v58, %s2573_s10 }
 0x1a2   : > { %v1274_v61 = vpop.permute.xlu0 %1273  ;;  %v1184_v6 = vsel %vm377_vm0, %v1182_v18, %v1183_v63  ;;  %v3245_v27 = vsel %vm402_vm1, %v1206_v4, %v1207_v21  ;;  %v1394_v4 = vsel %vm299_vm3, %v3110_v7, %v1228_v53  ;;  %v3266_v21 = vld [vmem:[#allocation2 + $0x90] sm:$0xff] }
 0x1a3   : > { %v1409_v45 = vsel %vm679_vm7, %v1401_v39, %v1274_v61 }
 0x1a6   : > { %v1298_v19 = vpop.permute.xlu1 %1297 }
 0x1a7   : > { %1355 = vrot.lane.b32.xlu2 %v3229_v58, %s2580_s11  ;;  %v1417_v46 = vsel %vm697_vm9, %v1409_v45, %v1298_v19 }
 0x1a8   : > { %1379 = vrot.lane.b32.xlu0 %v1184_v6, %s2581_s14  ;;  %v1425_v15 = vsel %vm1098_vm12, %v1417_v46, %v1322_v51  ;;  %v3268_v51 = vld [vmem:[#allocation2 + $0x98] sm:$0x3] }
 0x1a9   : > { %1239 = vrot.lane.b32.xlu1 %v1184_v6, %s2572_s9  ;;  %v1220_v7 = vrot.slane %v3268_v51, 1 }
 0x1aa   : > { %v1252_v12 = vpop.permute.xlu0 %1251 }
 0x1ae   : > { %v778_v22 = vpop.f32.mrf.mxu0 }
 0x1af   : > { %789 = vst.msk [vmem:[#allocation2 + $0x81] sm:$0xff] %vm299_vm3, %v778_v22  ;;  %1309 = vrot.lane.b32.xlu2 %v1184_v6, %s2576_s13  ;;  %v1402_v22 = vsel %vm661_vm5, %v1394_v4, %v1252_v12 }
 0x1b0   : > { %1333 = vrot.lane.b32.xlu0 %v3245_v27, %s2579_s26 }
 0x1b1   : > { %v1278_v29 = vpop.permute.xlu2 %1277 }
 0x1b3   : > { %v1276_v36 = vpop.permute.xlu1 %1275  ;;  %v1346_v38 = vpop.permute.xlu0 %1345 }
 0x1b4   : > { %v1433_v25 = vsel %vm1107_vm13, %v1425_v15, %v1346_v38  ;;  %v1410_v38 = vsel %vm679_vm7, %v1402_v22, %v1276_v36  ;;  %v850_v22 = vrot.slane %v2934_v9, 2 }
 0x1b6   : > { %v1141_v41 = vld [vmem:[#allocation2 + $0x80] sm:$0xff]  ;;  %v1142_v33 = vld [vmem:[#allocation2 + $0x88] sm:$0x3] }
 0x1b7   : > { %1263 = vrot.lane.b32.xlu2 %v3245_v27, %s2575_s12  ;;  %1357 = vrot.lane.b32.xlu1 %v1141_v41, %s2580_s11  ;;  %v1211_v47 = vrot.slane %v1141_v41, 1  ;;  %v1212_v50 = vrot.slane %v1142_v33, 1  ;;  %v1214_v63 = vrot.slane %v1141_v41, 2  ;;  %v1215_v6 = vrot.slane %v1142_v33, 2 }
 0x1b8   : > { %1287 = vrot.lane.b32.xlu0 %v1141_v41, %s2573_s10  ;;  %v1219_v41 = vrot.slane %v3266_v21, 1  ;;  %v1418_v33 = vsel %vm697_vm9, %v1410_v38, %v1300_v10  ;;  %v854_v38 = vrot.slane %v2944_v16, 2 }
 0x1b9   : > { %v1372_v48 = vpop.permute.xlu2 %1371  ;;  %v1213_v60 = vsel %vm377_vm0, %v1211_v47, %v1212_v50  ;;  %v3272_v35 = vsel %vm402_vm1, %v1214_v63, %v1215_v6  ;;  %v2324_v63 = vpack.i.bf16 %v2948_v20, %v2973_v8 }
 0x1ba   : > { %v1221_v36 = vsel %vm377_vm0, %v1219_v41, %v1220_v7 }
 0x1bb   : > { %v1370_v52 = vpop.permute.xlu1 %1369  ;;  %v1324_v59 = vpop.permute.xlu0 %1323 }
 0x1bc   : > { %v1441_v61 = vsel %vm1116_vm14, %v1433_v25, %v1370_v52  ;;  %v1426_v12 = vsel %vm1098_vm12, %v1418_v33, %v1324_v59 }
 0x1bf   : > { %1381 = vrot.lane.b32.xlu2 %v1213_v60, %s2581_s14  ;;  %1457 = vrot.lane.b32.xlu1 %v1441_v61, %s2572_s9 }
 0x1c1   : > { %v1256_v18 = vpop.permute.xlu2 %1255 }
 0x1c3   : > { %v1254_v19 = vpop.permute.xlu1 %1253  ;;  %v1230_v39 = vpop.permute.xlu0 %1229 }
 0x1c4   : > { %v1395_v10 = vsel %vm299_vm3, %v3125_v49, %v1230_v39  ;;  %v851_v49 = vrot.slane %v2938_v13, 2 }
 0x1c5   : > { %v1403_v25 = vsel %vm661_vm5, %v1395_v10, %v1254_v19  ;;  %v853_v19 = vrot.slane %v2941_v14, 2 }
 0x1c6   : > { %v852_v7 = vsel %vm402_vm1, %v850_v22, %v851_v49  ;;  %v1540_v49 = vld [vmem:[%s4065_s3 + $0xd8] sm:$0xff] }
 0x1c7   : > { %1335 = vrot.lane.b32.xlu2 %v3272_v35, %s2579_s26  ;;  %1311 = vrot.lane.b32.xlu1 %v1213_v60, %s2576_s13  ;;  %v3307_v33 = vsel %vm402_vm1, %v853_v19, %v854_v38  ;;  %v1538_v19 = vld [vmem:[%s4065_s3 + $0xc8] sm:$0xff] }
 0x1c8   : > { %v2314_v13 = vpack.i.bf16 %v3307_v33, %v852_v7  ;;  %v1536_v7 = vld [vmem:[%s4065_s3 + $0xb8] sm:$0xff] }
 0x1c9   : > { %v1350_v53 = vpop.permute.xlu2 %1349 }
 0x1cb   : > { %v1348_v45 = vpop.permute.xlu1 %1347 }
 0x1cc   : > { %v1434_v46 = vsel %vm1107_vm13, %v1426_v12, %v1348_v45  ;;  %v1302_v52 = vpop.permute.xlu0 %1301 }
 0x1cd   : > { %v1442_v47 = vsel %vm1116_vm14, %v1434_v46, %v1372_v48  ;;  %v1411_v48 = vsel %vm679_vm7, %v1403_v25, %v1278_v29  ;;  %v1543_v25 = vld [vmem:[%s4065_s3 + $0xf0] sm:$0xff] }
 0x1ce   : > { %1461 = vrot.lane.b32.xlu0 %v1442_v47, %s2572_s9  ;;  %v1419_v6 = vsel %vm697_vm9, %v1411_v48, %v1302_v52  ;;  %v1541_v48 = vld [vmem:[%s4065_s3 + $0xe0] sm:$0xff] }
 0x1cf   : > { %1383 = vrot.lane.b32.xlu1 %v1221_v36, %s2581_s14 }
 0x1d1   : > { %v1328_v50 = vpop.permute.xlu2 %1327 }
 0x1d3   : > { %v1326_v15 = vpop.permute.xlu1 %1325 }
 0x1d4   : > { %v1427_v4 = vsel %vm1098_vm12, %v1419_v6, %v1326_v15 }
 0x1d5   : > { %v1435_v29 = vsel %vm1107_vm13, %v1427_v4, %v1350_v53 }
 0x1d6   : > { %1359 = vrot.lane.b32.xlu0 %v3266_v21, %s2580_s11 }
 0x1d7   : > { %2325 = vrot.lane.b32.xlu1 %v2324_v63, %s2576_s13 }
 0x1d9   : > { %v1234_v59 = vpop.permute.xlu2 %1233 }
 0x1da   : > { %v1280_v60 = vpop.permute.xlu0 %1279  ;;  %v1397_v6 = vsel %vm299_vm3, %v3164_v5, %v1234_v59  ;;  %v1537_v59 = vld [vmem:[%s4065_s3 + $0xc0] sm:$0xff] }
 0x1db   : > { %v1232_v61 = vpop.permute.xlu1 %1231 }
 0x1dc   : > { %v1396_v9 = vsel %vm299_vm3, %v3145_v0, %v1232_v61  ;;  %v2319_v61 = vpack.i.bf16 %v2919_v11, %v2941_v14  ;;  %v1539_v14 = vld [vmem:[%s4065_s3 + $0xd0] sm:$0xff] }
 0x1dd   : > { %v1404_v12 = vsel %vm661_vm5, %v1396_v9, %v1256_v18  ;;  %v1544_v18 = vld [vmem:[%s4065_s3 + $0xf8] sm:$0xff] }
 0x1de   : > { %v1412_v45 = vsel %vm679_vm7, %v1404_v12, %v1280_v60  ;;  %1610 = vmatpush.msra.mxu2 %v1544_v18 }
 0x1e0   : > { %1611 = vmatpush.msra.mxu2 %v1543_v25 }
 0x1e1   : > { %v1306_v8 = vpop.permute.xlu2 %1305 }
 0x1e2   : > { %v1374_v39 = vpop.permute.xlu0 %1373 }
 0x1e3   : > { %v1304_v41 = vpop.permute.xlu1 %1303  ;;  %v1443_v20 = vsel %vm1116_vm14, %v1435_v29, %v1374_v39 }
 0x1e4   : > { %1465 = vrot.lane.b32.xlu2 %v1443_v20, %s2572_s9  ;;  %v1420_v36 = vsel %vm697_vm9, %v1412_v45, %v1304_v41  ;;  %v1533_v45 = vld [vmem:[%s4065_s3 + $0xa0] sm:$0xff] }
 0x1e5   : > { %v1428_v52 = vsel %vm1098_vm12, %v1420_v36, %v1328_v50  ;;  %v1542_v50 = vld [vmem:[%s4065_s3 + $0xe8] sm:$0xff]  ;;  %v857_v36 = vrot.slane %v2922_v54, 2 }
 0x1e6   : > { %1612 = vmatpush.msra.mxu2 %v1542_v50  ;;  %v1530_v54 = vld [vmem:[%s4065_s3 + $0x88] sm:$0xff] }
 0x1e8   : > { %1613 = vmatpush.msra.mxu2 %v1541_v48 }
 0x1e9   : > { %v3315_v46 = vpop.permute.xlu2 %1283 }
 0x1ea   : > { %v1258_v16 = vpop.permute.xlu0 %1257  ;;  %1614 = vmatpush.msra.mxu2 %v1540_v49 }
 0x1eb   : > { %v1282_v53 = vpop.permute.xlu1 %1281  ;;  %v1405_v22 = vsel %vm661_vm5, %v1397_v6, %v1258_v16  ;;  %v1534_v16 = vld [vmem:[%s4065_s3 + $0xa8] sm:$0xff] }
 0x1ec   : > { %2315 = vrot.lane.b32.xlu2 %v2314_v13, %s2575_s12  ;;  %v1413_v5 = vsel %vm679_vm7, %v1405_v22, %v1282_v53  ;;  %1615 = vmatpush.msra.mxu2 %v1539_v14  ;;  %v1535_v13 = vld [vmem:[%s4065_s3 + $0xb0] sm:$0xff]  ;;  %v2334_v53 = vpack.i.bf16 %v2925_v62, %v2919_v11 }
 0x1ed   : > { %v1421_v39 = vsel %vm697_vm9, %v1413_v5, %v1306_v8 }
 0x1ee   : > { %1616 = vmatpush.msra.mxu2 %v1538_v19 }
 0x1f0   : > { %1617 = vmatpush.msra.mxu2 %v1537_v59 }
 0x1f1   : > { %v1378_v60 = vpop.permute.xlu2 %1377 }
 0x1f2   : > { %v1352_v47 = vpop.permute.xlu0 %1351  ;;  %1618 = vmatpush.msra.mxu2 %v1536_v7 }
 0x1f3   : > { %v1436_v15 = vsel %vm1107_vm13, %v1428_v52, %v1352_v47  ;;  %v1376_v0 = vpop.permute.xlu1 %1375  ;;  %v859_v47 = vrot.slane %v2925_v62, 2  ;;  %v860_v52 = vrot.slane %v2928_v1, 2 }
 0x1f4   : > { %v1444_v10 = vsel %vm1116_vm14, %v1436_v15, %v1376_v0  ;;  %1619 = vmatpush.msra.mxu2 %v1535_v13  ;;  %v1532_v15 = vld [vmem:[%s4065_s3 + $0x98] sm:$0xff] }
 0x1f5   : > { %1469 = vrot.lane.b32.xlu0 %v1444_v10, %s2572_s9  ;;  %v1531_v10 = vld [vmem:[%s4065_s3 + $0x90] sm:$0xff]  ;;  %v3392_v25 = vsel %vm402_vm1, %v859_v47, %v860_v52  ;;  %v862_v47 = vrot.slane %v2964_v31, 2 }
 0x1f6   : > { %1620 = vmatpush.msra.mxu2 %v1534_v16 }
 0x1f8   : > { %1621 = vmatpush.msra.mxu2 %v1533_v45 }
 0x1f9   : > { %v1238_v38 = vpop.permute.xlu2 %1237 }
 0x1fa   : > { %v1330_v63 = vpop.permute.xlu0 %1329  ;;  %1622 = vmatpush.msra.mxu2 %v1532_v15 }
 0x1fb   : > { %v1260_v4 = vpop.permute.xlu1 %1259  ;;  %v1429_v41 = vsel %vm1098_vm12, %v1421_v39, %v1330_v63 }
 0x1fc   : > { %1623 = vmatpush.msra.mxu2 %v1531_v10 }
 0x1fd   : > { %2320 = vrot.lane.b32.xlu0 %v2319_v61, %s2573_s10 }
 0x1fe   : > { %1624 = vmatpush.msra.mxu2 %v1530_v54 }
 0x201   : > { %v1356_v0 = vpop.permute.xlu2 %1355 }
 0x202   : > { %v1236_v29 = vpop.permute.xlu0 %1235 }
 0x203   : > { %v1354_v20 = vpop.permute.xlu1 %1353  ;;  %v1398_v18 = vsel %vm299_vm3, %v3184_v26, %v1236_v29  ;;  %v1529_v26 = vld [vmem:[%s4065_s3 + $0x80] sm:$0xff] }
 0x204   : > { %v1437_v9 = vsel %vm1107_vm13, %v1429_v41, %v1354_v20  ;;  %v1406_v50 = vsel %vm661_vm5, %v1398_v18, %v1260_v4  ;;  %1625 = vmatpush.msra.mxu2 %v1529_v26  ;;  %v3460_v18 = vld [vmem:[%s2914_s8 + $0x60] sm:$0xff] }
 0x205   : > { %1459 = vrot.lane.b32.xlu0 %v3136_v56, %s2572_s9  ;;  %v1445_v8 = vsel %vm1116_vm14, %v1437_v9, %v1378_v60  ;;  %v856_v56 = vrot.slane %v2919_v11, 2  ;;  %v1414_v48 = vsel %vm679_vm7, %v1406_v50, %v3315_v46  ;;  %v1399_v46 = vsel %vm299_vm3, %v3206_v17, %v1238_v38 }
 0x206   : > { %1473 = vrot.lane.b32.xlu1 %v1445_v8, %s2572_s9  ;;  %v2349_v17 = vpack.i.bf16 %v2964_v31, %v2925_v62 }
 0x207   : > { %v858_v1 = vsel %vm402_vm1, %v856_v56, %v857_v36 }
 0x208   : > { %v2344_v61 = vpack.i.bf16 %v3392_v25, %v858_v1  ;;  %v2329_v59 = vpack.i.bf16 %v858_v1, %v3307_v33 }
 0x209   : > { %v1310_v6 = vpop.permute.xlu2 %1309 }
 0x20a   : > { %v1308_v12 = vpop.permute.xlu0 %1307 }
 0x20b   : > { %v1332_v11 = vpop.permute.xlu1 %1331  ;;  %v1422_v63 = vsel %vm697_vm9, %v1414_v48, %v1308_v12  ;;  %v1528_v48 = vld [vmem:[%s4065_s3 + $0x78] sm:$0xff] }
 0x20c   : > { %v1430_v22 = vsel %vm1098_vm12, %v1422_v63, %v1332_v11  ;;  %1569 = vmatpush.msra.mxu1 %v1528_v48  ;;  %v3585_v48 = vld [vmem:[%s2914_s8 + $0x98] sm:$0x3] }
 0x20d   : > { %v1438_v14 = vsel %vm1107_vm13, %v1430_v22, %v1356_v0  ;;  %v1526_v22 = vld [vmem:[%s4065_s3 + $0x68] sm:$0xff] }
 0x20e   : > { %2335 = vrot.lane.b32.xlu1 %v2334_v53, %s2580_s11 }
 0x211   : > { %v1264_v5 = vpop.permute.xlu2 %1263 }
 0x212   : > { %v1262_v60 = vpop.permute.xlu0 %1261 }
 0x213   : > { %v1286_v4 = vpop.permute.xlu1 %1285  ;;  %v1407_v29 = vsel %vm661_vm5, %v1399_v46, %v1262_v60  ;;  %v868_v60 = vrot.slane %v3460_v18, 2 }
 0x214   : > { %v1415_v41 = vsel %vm679_vm7, %v1407_v29, %v1286_v4 }
 0x215   : > { %v1423_v7 = vsel %vm697_vm9, %v1415_v41, %v1310_v6  ;;  %v1527_v6 = vld [vmem:[%s4065_s3 + $0x70] sm:$0xff]  ;;  %v1525_v41 = vld [vmem:[%s4065_s3 + $0x60] sm:$0xff] }
 0x216   : > { %2345 = vrot.lane.b32.xlu1 %v2344_v61, %s2575_s12  ;;  %1570 = vmatpush.msra.mxu1 %v1527_v6 }
 0x218   : > { %1571 = vmatpush.msra.mxu1 %v1526_v22  ;;  %v885_v22 = vrot.slane %v3585_v48, 1 }
 0x219   : > { %v1382_v8 = vpop.permute.xlu2 %1381 }
 0x21a   : > { %v1380_v49 = vpop.permute.xlu0 %1379  ;;  %1572 = vmatpush.msra.mxu1 %v1525_v41 }
 0x21b   : > { %v1446_v19 = vsel %vm1116_vm14, %v1438_v14, %v1380_v49  ;;  %v1240_v39 = vpop.permute.xlu1 %1239  ;;  %v3485_v49 = vld [vmem:[%s2914_s8 + $0x70] sm:$0xff]  ;;  %v805_v14 = vld [vmem:[%s2914_s8 + $0x78] sm:$0x3] }
 0x21c   : > { %1477 = vrot.lane.b32.xlu2 %v1446_v19, %s2572_s9  ;;  %v1400_v56 = vsel %vm299_vm3, %v3229_v58, %v1240_v39  ;;  %v863_v58 = vrot.slane %v2967_v32, 2  ;;  %v803_v32 = vld [vmem:[%s2914_s8 + $0x68] sm:$0x3]  ;;  %v844_v19 = vrot.slane %v3460_v18, 1  ;;  %v847_v39 = vrot.slane %v3485_v49, 1 }
 0x21d   : > { %v1408_v52 = vsel %vm661_vm5, %v1400_v56, %v1264_v5  ;;  %v869_v61 = vrot.slane %v803_v32, 2  ;;  %v845_v5 = vrot.slane %v803_v32, 1  ;;  %v848_v29 = vrot.slane %v805_v14, 1  ;;  %v807_v56 = vld [vmem:[%s2914_s8 + $0x88] sm:$0x3] }
 0x21f   : > { %v3482_v4 = vsel %vm402_vm1, %v868_v60, %v869_v61  ;;  %v1548_v60 = vld [vmem:[%s4065_s3 + $0x118] sm:$0xff]  ;;  %v3582_v61 = vld [vmem:[%s2914_s8 + $0x90] sm:$0xff] }
 0x220   : > { %2272 = vmatpush.msra.mxu3 %v1548_v60  ;;  %1663 = vmatpush.msrb.mxu2 %v1548_v60  ;;  %v884_v6 = vrot.slane %v3582_v61, 1 }
 0x221   : > { %v1336_v62 = vpop.permute.xlu2 %1335 }
 0x222   : > { %v1334_v20 = vpop.permute.xlu0 %1333 }
 0x223   : > { %v1431_v9 = vsel %vm1098_vm12, %v1423_v7, %v1334_v20  ;;  %v846_v20 = vsel %vm377_vm0, %v844_v19, %v845_v5  ;;  %v1524_v7 = vld [vmem:[%s4065_s3 + $0x58] sm:$0xff]  ;;  %v1545_v19 = vld [vmem:[%s4065_s3 + $0x100] sm:$0xff] }
 0x224   : > { %2330 = vrot.lane.b32.xlu2 %v2329_v59, %s2579_s26  ;;  %1573 = vmatpush.msra.mxu1 %v1524_v7 }
 0x229   : > { %v1358_v13 = vpop.permute.xlu1 %1357 }
 0x22a   : > { %v1439_v16 = vsel %vm1107_vm13, %v1431_v9, %v1358_v13  ;;  %v1288_v53 = vpop.permute.xlu0 %1287  ;;  %v2384_v9 = vpack.i.bf16 %v846_v20, %v2999_v43  ;;  %v849_v13 = vsel %vm377_vm0, %v847_v39, %v848_v29  ;;  %v1521_v43 = vld [vmem:[%s4065_s3 + $0x40] sm:$0xff]  ;;  %v2302_v29 = vunpack.i.l.bf16 %v3216_v30 }
 0x22b   : > { %v1447_v33 = vsel %vm1116_vm14, %v1439_v16, %v1382_v8  ;;  %v1416_v15 = vsel %vm679_vm7, %v1408_v52, %v1288_v53  ;;  %v1522_v8 = vld [vmem:[%s4065_s3 + $0x48] sm:$0xff]  ;;  %v2399_v16 = vpack.i.bf16 %v849_v13, %v846_v20  ;;  %v1519_v53 = vld [vmem:[%s4065_s3 + $0x30] sm:$0xff] }
 0x22c   : > { %2340 = vrot.lane.b32.xlu2 %v2960_v28, %s2581_s14  ;;  %1481 = vrot.lane.b32.xlu0 %v1447_v33, %s2572_s9  ;;  %v2354_v28 = vpack.i.bf16 %v2993_v40, %v2954_v24  ;;  %v865_v40 = vrot.slane %v2970_v2, 2  ;;  %v871_v33 = vrot.slane %v3485_v49, 2 }
 0x231   : > { %v3422_v38 = vpop.permute.xlu1 %1457 }
 0x232   : > { %v1505_v12 = vsel %vm299_vm3, %v858_v1, %v3422_v38 }
 0x233   : > { %1626 = vmatmul.f32.vlgmr.msra.gmra.mxu2 %v1505_v12  ;;  %v1520_v12 = vld [vmem:[%s4065_s3 + $0x38] sm:$0xff] }
 0x234   : > { %2350 = vrot.lane.b32.xlu2 %v2349_v17, %s2573_s10  ;;  %1463 = vrot.lane.b32.xlu0 %v3158_v3, %s2572_s9  ;;  %v2364_v3 = vpack.i.bf16 %v2970_v2, %v2964_v31  ;;  %v864_v31 = vsel %vm402_vm1, %v862_v47, %v863_v58  ;;  %v872_v17 = vrot.slane %v805_v14, 2  ;;  %v1517_v47 = vld [vmem:[%s4065_s3 + $0x20] sm:$0xff]  ;;  %v1515_v58 = vld [vmem:[%s4065_s3 + $0x10] sm:$0xff] }
 0x235   : > { %v2359_v59 = vpack.i.bf16 %v864_v31, %v3392_v25 }
 0x239   : > { %v1312_v45 = vpop.permute.xlu1 %1311 }
 0x23a   : > { %v1424_v0 = vsel %vm697_vm9, %v1416_v15, %v1312_v45  ;;  %v3531_v45 = vld [vmem:[%s2914_s8 + $0x80] sm:$0xff] }
 0x23b   : > { %v1432_v1 = vsel %vm1098_vm12, %v1424_v0, %v1336_v62  ;;  %v3527_v62 = vsel %vm402_vm1, %v871_v33, %v872_v17  ;;  %v1514_v0 = vld [vmem:[%s4065_s3 + $0x8] sm:$0xff]  ;;  %v2303_v17 = vunpack.i.h.bf16 %v3216_v30 }
 0x23c   : > { %1467 = vrot.lane.b32.xlu2 %v3178_v23, %s2572_s9  ;;  %2355 = vrot.lane.b32.xlu0 %v2354_v28, %s2576_s13  ;;  %v866_v23 = vrot.slane %v2978_v34, 2  ;;  %v2394_v28 = vpack.i.bf16 %v3485_v49, %v3460_v18 }
 0x23e   : > { %v3454_v10 = vsel %vm402_vm1, %v865_v40, %v866_v23  ;;  %v3456_v34 = vpop.permute.xlu2 %1465  ;;  %v879_v40 = vrot.slane %v3531_v45, 2  ;;  %v880_v23 = vrot.slane %v807_v56, 2 }
 0x23f   : > { %v1507_v26 = vsel %vm299_vm3, %v864_v31, %v3456_v34  ;;  %v2389_v46 = vpack.i.bf16 %v3482_v4, %v3454_v10 }
 0x240   : > { %v3436_v36 = vpop.permute.xlu0 %1461  ;;  %v3554_v52 = vsel %vm402_vm1, %v879_v40, %v880_v23 }
 0x241   : > { %v1506_v24 = vsel %vm299_vm3, %v3392_v25, %v3436_v36  ;;  %v1384_v11 = vpop.permute.xlu1 %1383  ;;  %v1523_v25 = vld [vmem:[%s4065_s3 + $0x50] sm:$0xff]  ;;  %v2424_v32 = vpack.i.bf16 %v3554_v52, %v3527_v62 }
 0x242   : > { %1629 = vmatmul.f32.gmra.mxu2 %v1506_v24  ;;  %1574 = vmatpush.msra.mxu1 %v1523_v25  ;;  %v2409_v24 = vpack.i.bf16 %v3527_v62, %v3482_v4  ;;  %v2556_v25 = vld [vmem:[%s2914_s8] sm:$0xff] }
 0x244   : > { %1471 = vrot.lane.b32.xlu2 %v3200_v42, %s2572_s9  ;;  %2365 = vrot.lane.b32.xlu0 %v2364_v3, %s2580_s11  ;;  %v2374_v42 = vpack.i.bf16 %v3454_v10, %v864_v31  ;;  %v1518_v3 = vld [vmem:[%s4065_s3 + $0x28] sm:$0xff] }
 0x245   : > { %1575 = vmatpush.msra.mxu1 %v1522_v8 }
 0x247   : > { %1576 = vmatpush.msra.mxu1 %v1521_v43 }
 0x248   : > { %v1360_v54 = vpop.permute.xlu0 %1359 }
 0x249   : > { %v1440_v50 = vsel %vm1107_vm13, %v1432_v1, %v1360_v54  ;;  %1577 = vmatpush.msra.mxu1 %v1520_v12  ;;  %v877_v54 = vrot.slane %v807_v56, 1  ;;  %v1513_v1 = vld [vmem:[%s4065_s3] sm:$0xff]  ;;  %v1222_v12 = vrot.slane %v3266_v21, 2  ;;  %v1223_v56 = vrot.slane %v3268_v51, 2 }
 0x24a   : > { %1632 = vmatmul.f32.gmra.mxu2 %v1507_v26  ;;  %v1448_v63 = vsel %vm1116_vm14, %v1440_v50, %v1384_v11  ;;  %v876_v11 = vrot.slane %v3531_v45, 1  ;;  %v2316_v50 = vpop.permute.xlu2 %2315  ;;  %v3575_v26 = vpop.permute.xlu1 %2325 }
 0x24b   : > { %1485 = vrot.lane.b32.xlu1 %v1448_v63, %s2572_s9  ;;  %1578 = vmatpush.msra.mxu1 %v1519_v53  ;;  %v1546_v63 = vld [vmem:[%s4065_s3 + $0x108] sm:$0xff]  ;;  %v2317_v41 = vunpack.i.l.bf16 %v2316_v50  ;;  %v2318_v53 = vunpack.i.h.bf16 %v2316_v50  ;;  %v2328_v21 = vunpack.i.h.bf16 %v3575_v26  ;;  %v2558_v50 = vld [vmem:[%s2914_s8 + $0x30] sm:$0xff] }
 0x24c   : > { %2375 = vrot.lane.b32.xlu0 %v2374_v42, %s2575_s12  ;;  %2385 = vrot.lane.b32.xlu2 %v2384_v9, %s2576_s13 }
 0x24d   : > { %1579 = vmatpush.msra.mxu1 %v1518_v3 }
 0x24f   : > { %1580 = vmatpush.msra.mxu1 %v1517_v47  ;;  %v1224_v47 = vsel %vm402_vm1, %v1222_v12, %v1223_v56 }
 0x253   : > { %2360 = vrot.lane.b32.xlu1 %v2359_v59, %s2579_s26 }
 0x254   : > { %2390 = vrot.lane.b32.xlu0 %v2389_v46, %s2579_s26  ;;  %2395 = vrot.lane.b32.xlu2 %v2394_v28, %s2580_s11  ;;  %v886_v46 = vsel %vm377_vm0, %v884_v6, %v885_v22 }
 0x25b   : > { %2370 = vrot.lane.b32.xlu1 %v3006_v44, %s2581_s14  ;;  %v2379_v44 = vpack.i.bf16 %v3460_v18, %v2970_v2  ;;  %v1516_v2 = vld [vmem:[%s4065_s3 + $0x18] sm:$0xff] }
 0x25c   : > { %2400 = vrot.lane.b32.xlu0 %v2399_v16, %s2581_s14  ;;  %1581 = vmatpush.msra.mxu1 %v1516_v2 }
 0x25d   : > { %2405 = vrot.lane.b32.xlu2 %v2399_v16, %s2572_s9 }
 0x25e   : > { %1582 = vmatpush.msra.mxu1 %v1515_v58 }
 0x260   : > { %1583 = vmatpush.msra.mxu1 %v1514_v0 }
 0x262   : > { %1584 = vmatpush.msra.mxu1 %v1513_v1 }
 0x263   : > { %2380 = vrot.lane.b32.xlu1 %v2379_v44, %s2573_s10 }
 0x264   : > { %2410 = vrot.lane.b32.xlu0 %v2409_v24, %s2575_s12  ;;  %v2557_v24 = vld [vmem:[%s2914_s8 + $0x10] sm:$0xff] }
 0x265   : > { %v1067_v40 = vsel %vm299_vm3, %v2557_v24, %v2303_v17 }
 0x266   : > { %v1075_v30 = vsel %vm661_vm5, %v1067_v40, %v2318_v53  ;;  %v2559_v53 = vld [vmem:[%s2914_s8 + $0x20] sm:$0xff] }
 0x267   : > { %v3556_v15 = vpop.permute.xlu0 %1469 }
 0x268   : > { %v1508_v31 = vsel %vm299_vm3, %v3454_v10, %v3556_v15  ;;  %v878_v10 = vsel %vm377_vm0, %v876_v11, %v877_v54 }
 0x269   : > { %1635 = vmatmul.f32.gmra.mxu2 %v1508_v31  ;;  %v2419_v42 = vpack.i.bf16 %v878_v10, %v849_v13  ;;  %v2327_v13 = vunpack.i.l.bf16 %v3575_v26  ;;  %v2308_v31 = vunpack.i.h.bf16 %v3193_v37 }
 0x26b   : > { %1475 = vrot.lane.b32.xlu1 %v3222_v55, %s2572_s9  ;;  %2420 = vrot.lane.b32.xlu2 %v2419_v42, %s2576_s13  ;;  %v1547_v55 = vld [vmem:[%s4065_s3 + $0x110] sm:$0xff]  ;;  %v1069_v26 = vsel %vm299_vm3, %v2558_v50, %v2308_v31 }
 0x26c   : > { %2425 = vrot.lane.b32.xlu0 %v2424_v32, %s2579_s26  ;;  %2273 = vmatpush.msra.mxu3 %v1547_v55 }
 0x26d   : > { %1664 = vmatpush.msrb.mxu2 %v1547_v55 }
 0x26e   : > { %2274 = vmatpush.msra.mxu3 %v1546_v63 }
 0x26f   : > { %1665 = vmatpush.msrb.mxu2 %v1546_v63  ;;  %v2321_v39 = vpop.permute.xlu0 %2320 }
 0x270   : > { %2275 = vmatpush.msra.mxu3 %v1545_v19  ;;  %v2322_v20 = vunpack.i.l.bf16 %v2321_v39  ;;  %v2323_v44 = vunpack.i.h.bf16 %v2321_v39  ;;  %v888_v39 = vrot.slane %v3585_v48, 2 }
 0x271   : > { %1666 = vmatpush.msrb.mxu2 %v1545_v19 }
 0x272   : > { %v1083_v2 = vsel %vm679_vm7, %v1075_v30, %v2323_v44 }
 0x273   : > { %1479 = vrot.lane.b32.xlu1 %v3245_v27, %s2572_s9  ;;  %v2414_v27 = vpack.i.bf16 %v3531_v45, %v3485_v49  ;;  %1030 = vrot.lane.b32.xlu2 %v3531_v45, %s2580_s11  ;;  %v1091_v32 = vsel %vm697_vm9, %v1083_v2, %v2328_v21 }
 0x274   : > { %1054 = vrot.lane.b32.xlu0 %v878_v10, %s2581_s14 }
 0x276   : > { %v3598_v14 = vpop.permute.xlu2 %1477 }
 0x277   : > { %v1510_v33 = vsel %vm299_vm3, %v3527_v62, %v3598_v14  ;;  %v1460_v19 = vpop.permute.xlu0 %1459 }
 0x278   : > { %v3605_v5 = vpop.permute.xlu1 %1473 }
 0x279   : > { %v1509_v59 = vsel %vm299_vm3, %v3482_v4, %v3605_v5  ;;  %v1066_v4 = vsel %vm299_vm3, %v2556_v25, %v2302_v29 }
 0x27a   : > { %1638 = vmatmul.f32.gmra.mxu2 %v1509_v59  ;;  %v1074_v9 = vsel %vm661_vm5, %v1066_v4, %v2317_v41 }
 0x27b   : > { %2415 = vrot.lane.b32.xlu1 %v2414_v27, %s2573_s10  ;;  %v1082_v16 = vsel %vm679_vm7, %v1074_v9, %v2322_v20  ;;  %1032 = vrot.lane.b32.xlu2 %v3582_v61, %s2580_s11 }
 0x27c   : > { %1056 = vrot.lane.b32.xlu0 %v886_v46, %s2581_s14  ;;  %v1090_v28 = vsel %vm697_vm9, %v1082_v16, %v2327_v13  ;;  %v887_v46 = vrot.slane %v3582_v61, 2 }
 0x27e   : > { %v2331_v7 = vpop.permute.xlu2 %2330  ;;  %v889_v20 = vsel %vm402_vm1, %v887_v46, %v888_v39  ;;  %v2561_v39 = vld [vmem:[%s2914_s8 + $0x50] sm:$0xff] }
 0x27f   : > { %v2332_v43 = vunpack.i.l.bf16 %v2331_v7  ;;  %v2333_v51 = vunpack.i.h.bf16 %v2331_v7 }
 0x280   : > { %v2336_v8 = vpop.permute.xlu1 %2335 }
 0x281   : > { %v2337_v45 = vunpack.i.l.bf16 %v2336_v8  ;;  %v1099_v62 = vsel %vm1098_vm12, %v1090_v28, %v2332_v43  ;;  %v2338_v11 = vunpack.i.h.bf16 %v2336_v8  ;;  %v1100_v10 = vsel %vm1098_vm12, %v1091_v32, %v2333_v51 }
 0x282   : > { %1641 = vmatmul.f32.gmra.mxu2 %v1510_v33  ;;  %v2307_v8 = vunpack.i.l.bf16 %v3193_v37  ;;  %v1489_v43 = vsel %vm299_vm3, %v3422_v38, %v1460_v19  ;;  %v2312_v51 = vunpack.i.l.bf16 %v3224_v57 }
 0x283   : > { %1483 = vrot.lane.b32.xlu1 %v3272_v35, %s2572_s9  ;;  %v1108_v35 = vsel %vm1107_vm13, %v1099_v62, %v2337_v45  ;;  %v1109_v63 = vsel %vm1107_vm13, %v1100_v10, %v2338_v11  ;;  %v2560_v10 = vld [vmem:[%s2914_s8 + $0x40] sm:$0xff] }
 0x284   : > { %v1068_v28 = vsel %vm299_vm3, %v2559_v53, %v2307_v8 }
 0x286   : > { %v2341_v3 = vpop.permute.xlu2 %2340 }
 0x287   : > { %v2342_v23 = vunpack.i.l.bf16 %v2341_v3  ;;  %v2343_v1 = vunpack.i.h.bf16 %v2341_v3 }
 0x288   : > { %v2346_v58 = vpop.permute.xlu1 %2345 }
 0x289   : > { %v1117_v0 = vsel %vm1116_vm14, %v1108_v35, %v2342_v23  ;;  %v2348_v54 = vunpack.i.h.bf16 %v2346_v58  ;;  %v1118_v22 = vsel %vm1116_vm14, %v1109_v63, %v2343_v1  ;;  %v2347_v16 = vunpack.i.l.bf16 %v2346_v58 }
 0x28a   : > { %1585 = vmatmul.f32.vlgmr.msra.gmra.mxu1 %v1117_v0  ;;  %v2313_v1 = vunpack.i.h.bf16 %v3224_v57 }
 0x28b   : > { %1487 = vrot.lane.b32.xlu1 %v1224_v47, %s2572_s9  ;;  %v1077_v55 = vsel %vm661_vm5, %v1069_v26, %v2348_v54  ;;  %v1076_v56 = vsel %vm661_vm5, %v1068_v28, %v2347_v16 }
 0x28e   : > { %v2351_v42 = vpop.permute.xlu2 %2350 }
 0x28f   : > { %v2353_v60 = vunpack.i.h.bf16 %v2351_v42  ;;  %v2352_v33 = vunpack.i.l.bf16 %v2351_v42  ;;  %v1070_v42 = vsel %vm299_vm3, %v2560_v10, %v2312_v51 }
 0x291   : > { %v1085_v6 = vsel %vm679_vm7, %v1077_v55, %v2353_v60  ;;  %v1084_v37 = vsel %vm679_vm7, %v1076_v56, %v2352_v33 }
 0x292   : > { %1588 = vmatmul.f32.gmra.mxu1 %v1118_v22 }
 0x296   : > { %v1468_v27 = vpop.permute.xlu2 %1467 }
 0x297   : > { %v1491_v59 = vsel %vm299_vm3, %v3456_v34, %v1468_v27 }
 0x298   : > { %2255 = vmatmul.msk.f32.vlgmr.msra.gmra.mxu3 %vm661_vm5, %v1491_v59 }
 0x29e   : > { %v1472_v29 = vpop.permute.xlu2 %1471  ;;  %v3656_v41 = vpop.permute.xlu0 %1481 }
 0x29f   : > { %v1511_v7 = vsel %vm299_vm3, %v3554_v52, %v3656_v41  ;;  %v1492_v25 = vsel %vm299_vm3, %v3556_v15, %v1472_v29  ;;  %v1071_v29 = vsel %vm299_vm3, %v2561_v39, %v2313_v1  ;;  %v2050_v39 = vld [vmem:[%s4067_s5 + $0x88] sm:$0xff] }
 0x2a0   : > { %1644 = vmatmul.f32.gmra.mxu2 %v1511_v7  ;;  %2256 = vmatmul.msk.f32.gmra.mxu3 %vm661_vm5, %v1492_v25 }
 0x2a1   : > { %2126 = vmatpush.msrb.mxu0 %v2050_v39  ;;  %2276 = vmatpush.msrb.mxu1 %v2050_v39 }
 0x2a6   : > { %v1464_v34 = vpop.permute.xlu0 %1463  ;;  %v3670_v52 = vpop.permute.xlu2 %2385 }
 0x2a7   : > { %v1490_v40 = vsel %vm299_vm3, %v3436_v36, %v1464_v34  ;;  %v2387_v11 = vunpack.i.l.bf16 %v3670_v52  ;;  %v2388_v25 = vunpack.i.h.bf16 %v3670_v52 }
 0x2ae   : > { %v2356_v61 = vpop.permute.xlu0 %2355  ;;  %v2396_v23 = vpop.permute.xlu2 %2395 }
 0x2af   : > { %v2357_v17 = vunpack.i.l.bf16 %v2356_v61  ;;  %v2358_v30 = vunpack.i.h.bf16 %v2356_v61  ;;  %v2397_v59 = vunpack.i.l.bf16 %v2396_v23  ;;  %v2398_v33 = vunpack.i.h.bf16 %v2396_v23 }
 0x2b1   : > { %v1092_v44 = vsel %vm697_vm9, %v1084_v37, %v2357_v17  ;;  %v1093_v58 = vsel %vm697_vm9, %v1085_v6, %v2358_v30 }
 0x2b6   : > { %v2366_v4 = vpop.permute.xlu0 %2365 }
 0x2b7   : > { %v2367_v62 = vunpack.i.l.bf16 %v2366_v4  ;;  %v2368_v0 = vunpack.i.h.bf16 %v2366_v4  ;;  %v2406_v60 = vpop.permute.xlu2 %2405 }
 0x2b8   : > { %v2407_v56 = vunpack.i.l.bf16 %v2406_v60 }
 0x2bd   : > { %v3665_v48 = vpop.permute.xlu1 %1485 }
 0x2be   : > { %v1512_v9 = vsel %vm299_vm3, %v889_v20, %v3665_v48  ;;  %v2376_v13 = vpop.permute.xlu0 %2375 }
 0x2bf   : > { %1647 = vmatmul.f32.gmra.mxu2 %v1512_v9  ;;  %v2377_v31 = vunpack.i.l.bf16 %v2376_v13  ;;  %v2378_v55 = vunpack.i.h.bf16 %v2376_v13 }
 0x2c1   : > { %v1078_v63 = vsel %vm661_vm5, %v1070_v42, %v2377_v31  ;;  %v1079_v7 = vsel %vm661_vm5, %v1071_v29, %v2378_v55  ;;  %v3755_v29 = vld [vmem:[%s4066_s4] ss:$0 sm:$0xff] }
 0x2c5   : > { %v2361_v15 = vpop.permute.xlu1 %2360 }
 0x2c6   : > { %v3675_v12 = vpop.permute.xlu0 %2390  ;;  %v2362_v45 = vunpack.i.l.bf16 %v2361_v15  ;;  %v2363_v35 = vunpack.i.h.bf16 %v2361_v15 }
 0x2c7   : > { %2253 = vmatmul.msk.f32.vlgmr.msrb.gmra.mxu2 %vm661_vm5, %v1489_v43  ;;  %v2392_v50 = vunpack.i.l.bf16 %v3675_v12  ;;  %v2393_v13 = vunpack.i.h.bf16 %v3675_v12  ;;  %v2421_v43 = vpop.permute.xlu2 %2420  ;;  %v2408_v12 = vunpack.i.h.bf16 %v2406_v60 }
 0x2c8   : > { %v1101_v3 = vsel %vm1098_vm12, %v1092_v44, %v2362_v45  ;;  %v1102_v36 = vsel %vm1098_vm12, %v1093_v58, %v2363_v35  ;;  %v2423_v30 = vunpack.i.h.bf16 %v2421_v43 }
 0x2c9   : > { %v1110_v21 = vsel %vm1107_vm13, %v1101_v3, %v2367_v62  ;;  %v1111_v6 = vsel %vm1107_vm13, %v1102_v36, %v2368_v0  ;;  %v1073_v3 = vsel %vm299_vm3, %v3485_v49, %v2408_v12 }
 0x2cd   : > { %v2371_v38 = vpop.permute.xlu1 %2370 }
 0x2ce   : > { %v2372_v24 = vunpack.i.l.bf16 %v2371_v38  ;;  %v2401_v2 = vpop.permute.xlu0 %2400  ;;  %v2373_v32 = vunpack.i.h.bf16 %v2371_v38  ;;  %v1072_v38 = vsel %vm299_vm3, %v3460_v18, %v2407_v56 }
 0x2cf   : > { %2254 = vmatmul.msk.f32.gmra.mxu2 %vm661_vm5, %v1490_v40  ;;  %v2402_v61 = vunpack.i.l.bf16 %v2401_v2  ;;  %v2403_v53 = vunpack.i.h.bf16 %v2401_v2 }
 0x2d0   : > { %v1119_v47 = vsel %vm1116_vm14, %v1110_v21, %v2372_v24  ;;  %v1120_v27 = vsel %vm1116_vm14, %v1111_v6, %v2373_v32  ;;  %v1031_v24 = vpop.permute.xlu2 %1030  ;;  %v1627_v6 = vpop.f32.mrf.mxu2 }
 0x2d1   : > { %1591 = vmatmul.f32.gmra.mxu1 %v1119_v47 }
 0x2d5   : > { %v2381_v54 = vpop.permute.xlu1 %2380 }
 0x2d6   : > { %v2382_v26 = vunpack.i.l.bf16 %v2381_v54  ;;  %v2383_v22 = vunpack.i.h.bf16 %v2381_v54  ;;  %v2411_v46 = vpop.permute.xlu0 %2410 }
 0x2d7   : > { %v2413_v44 = vunpack.i.h.bf16 %v2411_v46  ;;  %v2412_v62 = vunpack.i.l.bf16 %v2411_v46 }
 0x2d8   : > { %v1086_v19 = vsel %vm679_vm7, %v1078_v63, %v2382_v26  ;;  %v1087_v34 = vsel %vm679_vm7, %v1079_v7, %v2383_v22  ;;  %v1033_v54 = vpop.permute.xlu2 %1032  ;;  %v1630_v22 = vpop.f32.mrf.mxu2 }
 0x2d9   : > { %1594 = vmatmul.f32.gmra.mxu1 %v1120_v27  ;;  %v1094_v57 = vsel %vm697_vm9, %v1086_v19, %v2387_v11  ;;  %v1095_v16 = vsel %vm697_vm9, %v1087_v34, %v2388_v25  ;;  %v1081_v40 = vsel %vm661_vm5, %v1073_v3, %v2413_v44  ;;  %v1080_v23 = vsel %vm661_vm5, %v1072_v38, %v2412_v62 }
 0x2da   : > { %v1103_v20 = vsel %vm1098_vm12, %v1094_v57, %v2392_v50  ;;  %v1104_v52 = vsel %vm1098_vm12, %v1095_v16, %v2393_v13 }
 0x2db   : > { %v1112_v9 = vsel %vm1107_vm13, %v1103_v20, %v2397_v59  ;;  %v1113_v45 = vsel %vm1107_vm13, %v1104_v52, %v2398_v33 }
 0x2dc   : > { %v1121_v15 = vsel %vm1116_vm14, %v1112_v9, %v2402_v61  ;;  %v1122_v37 = vsel %vm1116_vm14, %v1113_v45, %v2403_v53 }
 0x2dd   : > { %v1476_v4 = vpop.permute.xlu1 %1475 }
 0x2de   : > { %v1493_v8 = vsel %vm299_vm3, %v3605_v5, %v1476_v4  ;;  %v2426_v17 = vpop.permute.xlu0 %2425 }
 0x2df   : > { %2257 = vmatmul.msk.f32.gmra.mxu3 %vm661_vm5, %v1493_v8  ;;  %v2427_v47 = vunpack.i.l.bf16 %v2426_v17  ;;  %v2428_v58 = vunpack.i.h.bf16 %v2426_v17 }
 0x2e0   : > { %v1633_v19 = vpop.f32.mrf.mxu2 }
 0x2e1   : > { %1597 = vmatmul.f32.gmra.mxu1 %v1121_v15 }
 0x2e5   : > { %v1480_v28 = vpop.permute.xlu1 %1479 }
 0x2e6   : > { %v1494_v5 = vsel %vm299_vm3, %v3598_v14, %v1480_v28  ;;  %v2422_v14 = vunpack.i.l.bf16 %v2421_v43  ;;  %v1055_v35 = vpop.permute.xlu0 %1054 }
 0x2e7   : > { %2258 = vmatmul.msk.f32.gmra.mxu3 %vm661_vm5, %v1494_v5 }
 0x2e9   : > { %1600 = vmatmul.f32.gmra.mxu1 %v1122_v37 }
 0x2ec   : > { %v1636_v27 = vpop.f32.mrf.mxu2 }
 0x2ed   : > { %v2416_v21 = vpop.permute.xlu1 %2415 }
 0x2ee   : > { %v2418_v2 = vunpack.i.h.bf16 %v2416_v21  ;;  %v2417_v51 = vunpack.i.l.bf16 %v2416_v21  ;;  %v1057_v26 = vpop.permute.xlu0 %1056  ;;  %v3774_v21 = vld [vmem:[#allocation3] sm:$0xff] }
 0x2ef   : > { %v1769_v39 = vrot.slane %v3774_v21, 2 }
 0x2f0   : > { %v1089_v0 = vsel %vm679_vm7, %v1081_v40, %v2418_v2  ;;  %v1088_v49 = vsel %vm679_vm7, %v1080_v23, %v2417_v51  ;;  %v1710_v51 = vld [vmem:[#allocation3 + $0x8] sm:$0x3] }
 0x2f1   : > { %v1096_v31 = vsel %vm697_vm9, %v1088_v49, %v2422_v14  ;;  %v1097_v18 = vsel %vm697_vm9, %v1089_v0, %v2423_v30  ;;  %v1745_v49 = vrot.slane %v3774_v21, 1 }
 0x2f2   : > { %v1105_v32 = vsel %vm1098_vm12, %v1096_v31, %v2427_v47  ;;  %v1106_v1 = vsel %vm1098_vm12, %v1097_v18, %v2428_v58 }
 0x2f3   : > { %v1114_v36 = vsel %vm1107_vm13, %v1105_v32, %v1031_v24  ;;  %v1115_v50 = vsel %vm1107_vm13, %v1106_v1, %v1033_v54 }
 0x2f4   : > { %v1123_v11 = vsel %vm1116_vm14, %v1114_v36, %v1055_v35  ;;  %v1124_v60 = vsel %vm1116_vm14, %v1115_v50, %v1057_v26 }
 0x2f5   : > { %v1484_v10 = vpop.permute.xlu1 %1483  ;;  %1603 = vmatmul.f32.gmra.mxu1 %v1123_v11  ;;  %v1746_v11 = vrot.slane %v1710_v51, 1 }
 0x2f6   : > { %v1495_v42 = vsel %vm299_vm3, %v3656_v41, %v1484_v10 }
 0x2f7   : > { %2259 = vmatmul.msk.f32.gmra.mxu3 %vm661_vm5, %v1495_v42 }
 0x2fd   : > { %v1488_v55 = vpop.permute.xlu1 %1487  ;;  %1606 = vmatmul.f32.gmra.mxu1 %v1124_v60  ;;  %v1639_v59 = vpop.f32.mrf.mxu2 }
 0x2fe   : > { %v1496_v63 = vsel %vm299_vm3, %v3665_v48, %v1488_v55  ;;  %v2049_v48 = vld [vmem:[%s4067_s5 + $0x80] sm:$0xff] }
 0x2ff   : > { %2260 = vmatmul.msk.f32.gmra.mxu3 %vm661_vm5, %v1496_v63  ;;  %2127 = vmatpush.msrb.mxu0 %v2049_v48 }
 0x300   : > { %2277 = vmatpush.msrb.mxu1 %v2049_v48 }
 0x305   : > { %v3742_v41 = vpop.f32.mrf.mxu2 }
 0x307   : > { %v1586_v46 = vpop.f32.mrf.mxu1 }
 0x308   : > { %v1587_v7 = vadd.f32 %v3755_v29, %v1586_v46 }
 0x30a   : > { %v1628_v34 = vadd.f32 %v1627_v6, %v1587_v7 }
 0x30f   : > { %v1589_v25 = vpop.f32.mrf.mxu1 }
 0x310   : > { %v1590_v9 = vadd.f32 %v3755_v29, %v1589_v25 }
 0x312   : > { %v1631_v33 = vadd.f32 %v1630_v22, %v1590_v9 }
 0x31b   : > { %v1674_v15 = vpop.f32.mrf.mxu3 }
 0x323   : > { %v3744_v57 = vpop.f32.mrf.mxu2  ;;  %v1677_v37 = vpop.f32.mrf.mxu3 }
 0x342   : > { %v3757_v20 = vpop.f32.mrf.mxu2 }
 0x34a   : > { %v1668_v61 = vpop.f32.mrf.mxu2 }
 0x34b   : > { %v1669_v4 = vadd.f32 %v1668_v61, %v1628_v34 }
 0x34d   : > { %v1692_v13 = vmax.f32 %v1669_v4, 0.0 }
 0x34e   : > { %v1592_v8 = vpop.f32.mrf.mxu1 }
 0x34f   : > { %1701 = vst.msk [vmem:[#allocation3 + $0x11] sm:$0xff] %vm299_vm3, %v1692_v13  ;;  %v1593_v16 = vadd.f32 %v3755_v29, %v1592_v8  ;;  %v1770_v13 = vrot.slane %v1710_v51, 2 }
 0x351   : > { %v1634_v43 = vadd.f32 %v1633_v19, %v1593_v16 }
 0x352   : > { %v1671_v52 = vpop.f32.mrf.mxu2 }
 0x353   : > { %v1675_v17 = vadd.f32 %v1674_v15, %v1634_v43  ;;  %v1672_v53 = vadd.f32 %v1671_v52, %v1631_v33  ;;  %v1747_v15 = vsel %vm377_vm0, %v1745_v49, %v1746_v11 }
 0x355   : > { %v1694_v28 = vmax.f32 %v1675_v17, 0.0  ;;  %v1693_v45 = vmax.f32 %v1672_v53, 0.0 }
 0x356   : > { %v1595_v12 = vpop.f32.mrf.mxu1  ;;  %v3784_v18 = vld [vmem:[#allocation3 + $0x10] sm:$0xff]  ;;  %v1712_v32 = vld [vmem:[#allocation3 + $0x18] sm:$0x3] }
 0x357   : > { %1703 = vst.msk [vmem:[#allocation3 + $0x31] sm:$0xff] %vm299_vm3, %v1694_v28  ;;  %v1596_v56 = vadd.f32 %v3755_v29, %v1595_v12  ;;  %v1772_v8 = vrot.slane %v3784_v18, 2  ;;  %v1773_v16 = vrot.slane %v1712_v32, 2  ;;  %v1771_v28 = vsel %vm402_vm1, %v1769_v39, %v1770_v13 }
 0x358   : > { %1702 = vst.msk [vmem:[#allocation3 + $0x21] sm:$0xff] %vm299_vm3, %v1693_v45 }
 0x359   : > { %v1637_v5 = vadd.f32 %v1636_v27, %v1596_v56  ;;  %v1748_v27 = vrot.slane %v3784_v18, 1  ;;  %v1774_v53 = vsel %vm402_vm1, %v1772_v8, %v1773_v16 }
 0x35b   : > { %v1678_v44 = vadd.f32 %v1677_v37, %v1637_v5  ;;  %v2449_v5 = vpack.i.bf16 %v1774_v53, %v1771_v28 }
 0x35d   : > { %v1695_v62 = vmax.f32 %v1678_v44, 0.0 }
 0x35e   : > { %v1598_v3 = vpop.f32.mrf.mxu1  ;;  %v1716_v2 = vld [vmem:[#allocation3 + $0x38] sm:$0x3]  ;;  %v3781_v0 = vld [vmem:[#allocation3 + $0x30] sm:$0xff] }
 0x35f   : > { %1704 = vst.msk [vmem:[#allocation3 + $0x41] sm:$0xff] %vm299_vm3, %v1695_v62  ;;  %v1599_v38 = vadd.f32 %v3755_v29, %v1598_v3  ;;  %v3768_v24 = vld [vmem:[#allocation3 + $0x20] sm:$0xff]  ;;  %v3770_v40 = vld [vmem:[#allocation3 + $0x28] sm:$0x3]  ;;  %v1755_v36 = vrot.slane %v1716_v2, 1  ;;  %v1778_v42 = vrot.slane %v3781_v0, 2 }
 0x360   : > { %v1775_v23 = vrot.slane %v3768_v24, 2  ;;  %v1776_v30 = vrot.slane %v3770_v40, 2  ;;  %v1779_v50 = vrot.slane %v1716_v2, 2  ;;  %v1754_v26 = vrot.slane %v3781_v0, 1 }
 0x361   : > { %v1640_v14 = vadd.f32 %v1639_v59, %v1599_v38  ;;  %v1749_v59 = vrot.slane %v1712_v32, 1  ;;  %v1752_v17 = vrot.slane %v3770_v40, 1  ;;  %v1751_v45 = vrot.slane %v3768_v24, 1 }
 0x362   : > { %v1680_v35 = vpop.f32.mrf.mxu3  ;;  %v3777_v47 = vsel %vm402_vm1, %v1775_v23, %v1776_v30  ;;  %v3801_v7 = vsel %vm402_vm1, %v1778_v42, %v1779_v50  ;;  %v1756_v34 = vsel %vm377_vm0, %v1754_v26, %v1755_v36  ;;  %v2454_v56 = vpack.i.bf16 %v3768_v24, %v3784_v18 }
 0x363   : > { %v1681_v58 = vadd.f32 %v1680_v35, %v1640_v14  ;;  %2261 = vmatmul.msk.f32.vlgmr.msrb.gmra.mxu0 %vm299_vm3, %v3777_v47  ;;  %v1750_v43 = vsel %vm377_vm0, %v1748_v27, %v1749_v59  ;;  %v1753_v62 = vsel %vm377_vm0, %v1751_v45, %v1752_v17  ;;  %v2469_v51 = vpack.i.bf16 %v3777_v47, %v1774_v53 }
 0x364   : > { %v2444_v52 = vpack.i.bf16 %v1750_v43, %v1747_v15  ;;  %v2464_v23 = vpack.i.bf16 %v1753_v62, %v1750_v43  ;;  %v2459_v49 = vpack.i.bf16 %v3781_v0, %v3768_v24 }
 0x365   : > { %v1696_v31 = vmax.f32 %v1681_v58, 0.0 }
 0x366   : > { %v1601_v54 = vpop.f32.mrf.mxu1  ;;  %v3786_v1 = vld [vmem:[#allocation3 + $0x40] sm:$0xff]  ;;  %v1718_v10 = vld [vmem:[#allocation3 + $0x48] sm:$0x3] }
 0x367   : > { %1705 = vst.msk [vmem:[#allocation3 + $0x51] sm:$0xff] %vm299_vm3, %v1696_v31  ;;  %v1602_v60 = vadd.f32 %v3755_v29, %v1601_v54  ;;  %v2429_v55 = vpack.i.bf16 %v3786_v1, %v3781_v0  ;;  %v1758_v63 = vrot.slane %v1718_v10, 1  ;;  %v1781_v6 = vrot.slane %v3786_v1, 2 }
 0x368   : > { %v1782_v22 = vrot.slane %v1718_v10, 2  ;;  %v1757_v19 = vrot.slane %v3786_v1, 1  ;;  %v2474_v10 = vpack.i.bf16 %v1756_v34, %v1753_v62  ;;  %v2048_v62 = vld [vmem:[%s4067_s5 + $0x78] sm:$0xff] }
 0x369   : > { %2430 = vrot.lane.b32.xlu1 %v2429_v55, %s2573_s10  ;;  %v1643_v46 = vadd.f32 %v3742_v41, %v1602_v60  ;;  %2071 = vmatpush.msrb.mxu3 %v2048_v62 }
 0x36a   : > { %v1683_v48 = vpop.f32.mrf.mxu3  ;;  %v3804_v25 = vsel %vm402_vm1, %v1781_v6, %v1782_v22  ;;  %v3808_v61 = vsel %vm377_vm0, %v1757_v19, %v1758_v63 }
 0x36b   : > { %v1684_v4 = vadd.f32 %v1683_v48, %v1643_v46  ;;  %v2439_v9 = vpack.i.bf16 %v3804_v25, %v3801_v7  ;;  %2262 = vmatmul.msk.f32.gmra.mxu0 %vm299_vm3, %v3801_v7  ;;  %v2434_v41 = vpack.i.bf16 %v3808_v61, %v1756_v34 }
 0x36d   : > { %v1697_v33 = vmax.f32 %v1684_v4, 0.0  ;;  %2440 = vrot.lane.b32.xlu0 %v2439_v9, %s2579_s26  ;;  %2435 = vrot.lane.b32.xlu2 %v2434_v41, %s2576_s13 }
 0x36e   : > { %v3830_v37 = vld [vmem:[#allocation3 + $0x50] sm:$0xff]  ;;  %v1720_v44 = vld [vmem:[#allocation3 + $0x58] sm:$0x3] }
 0x36f   : > { %1706 = vst.msk [vmem:[#allocation3 + $0x61] sm:$0xff] %vm299_vm3, %v1697_v33  ;;  %v1784_v38 = vrot.slane %v3830_v37, 2  ;;  %v1785_v40 = vrot.slane %v1720_v44, 2  ;;  %v1761_v55 = vrot.slane %v1720_v44, 1  ;;  %v1760_v63 = vrot.slane %v3830_v37, 1 }
 0x370   : > { %v2479_v19 = vpack.i.bf16 %v3830_v37, %v3786_v1 }
 0x371   : > { %2445 = vrot.lane.b32.xlu1 %v2444_v52, %s2572_s9  ;;  %v1786_v2 = vsel %vm402_vm1, %v1784_v38, %v1785_v40  ;;  %v1762_v59 = vsel %vm377_vm0, %v1760_v63, %v1761_v55  ;;  %v2046_v38 = vld [vmem:[%s4067_s5 + $0x68] sm:$0xff]  ;;  %v3907_v40 = vld [vmem:[#allocation3 + $0x98] sm:$0x3] }
 0x372   : > { %v1604_v12 = vpop.f32.mrf.mxu1  ;;  %v2499_v39 = vpack.i.bf16 %v1762_v59, %v3808_v61  ;;  %v2504_v9 = vpack.i.bf16 %v1786_v2, %v3804_v25 }
 0x373   : > { %2263 = vmatmul.msk.f32.gmra.mxu0 %vm299_vm3, %v3804_v25  ;;  %v1605_v3 = vadd.f32 %v3755_v29, %v1604_v12 }
 0x375   : > { %2455 = vrot.lane.b32.xlu0 %v2454_v56, %s2573_s10  ;;  %2450 = vrot.lane.b32.xlu2 %v2449_v5, %s2575_s12  ;;  %v1646_v30 = vadd.f32 %v3744_v57, %v1605_v3  ;;  %v2047_v3 = vld [vmem:[%s4067_s5 + $0x70] sm:$0xff] }
 0x376   : > { %v3844_v31 = vld [vmem:[#allocation3 + $0x60] sm:$0xff]  ;;  %v1722_v32 = vld [vmem:[#allocation3 + $0x68] sm:$0x3]  ;;  %2072 = vmatpush.msrb.mxu3 %v2047_v3 }
 0x377   : > { %v1787_v57 = vrot.slane %v3844_v31, 2  ;;  %v1788_v54 = vrot.slane %v1722_v32, 2  ;;  %v1764_v48 = vrot.slane %v1722_v32, 1  ;;  %v2509_v15 = vpack.i.bf16 %v3844_v31, %v3830_v37  ;;  %v2041_v32 = vld [vmem:[%s4067_s5 + $0x40] sm:$0xff] }
 0x378   : > { %2073 = vmatpush.msrb.mxu3 %v2046_v38 }
 0x379   : > { %2465 = vrot.lane.b32.xlu1 %v2464_v23, %s2576_s13  ;;  %v1789_v26 = vsel %vm402_vm1, %v1787_v57, %v1788_v54  ;;  %v2045_v23 = vld [vmem:[%s4067_s5 + $0x60] sm:$0xff]  ;;  %v2038_v57 = vld [vmem:[%s4067_s5 + $0x28] sm:$0xff] }
 0x37a   : > { %v1607_v14 = vpop.f32.mrf.mxu1  ;;  %v1686_v35 = vpop.f32.mrf.mxu3  ;;  %v2519_v25 = vpack.i.bf16 %v1789_v26, %v1786_v2  ;;  %2074 = vmatpush.msrb.mxu3 %v2045_v23  ;;  %v2037_v54 = vld [vmem:[%s4067_s5 + $0x20] sm:$0xff] }
 0x37b   : > { %v1687_v58 = vadd.f32 %v1686_v35, %v1646_v30  ;;  %2264 = vmatmul.msk.f32.gmra.mxu0 %vm299_vm3, %v1786_v2  ;;  %v1608_v36 = vadd.f32 %v3755_v29, %v1607_v14  ;;  %v2494_v29 = vpack.i.bf16 %v3801_v7, %v3777_v47  ;;  %v1763_v7 = vrot.slane %v3844_v31, 1  ;;  %v2044_v30 = vld [vmem:[%s4067_s5 + $0x58] sm:$0xff]  ;;  %v3916_v14 = vld [vmem:[#allocation3 + $0x90] sm:$0xff] }
 0x37c   : > { %v1803_v35 = vrot.slane %v3916_v14, 1  ;;  %v1804_v2 = vrot.slane %v3907_v40, 1  ;;  %2075 = vmatpush.msrb.mxu3 %v2044_v30 }
 0x37d   : > { %v1698_v11 = vmax.f32 %v1687_v58, 0.0  ;;  %2460 = vrot.lane.b32.xlu0 %v2459_v49, %s2580_s11  ;;  %2470 = vrot.lane.b32.xlu2 %v2469_v51, %s2579_s26  ;;  %v1649_v42 = vadd.f32 %v3757_v20, %v1608_v36  ;;  %v1765_v8 = vsel %vm377_vm0, %v1763_v7, %v1764_v48  ;;  %v2043_v51 = vld [vmem:[%s4067_s5 + $0x50] sm:$0xff]  ;;  %v2042_v49 = vld [vmem:[%s4067_s5 + $0x48] sm:$0xff] }
 0x37e   : > { %v2514_v61 = vpack.i.bf16 %v1765_v8, %v1762_v59  ;;  %v1805_v58 = vsel %vm377_vm0, %v1803_v35, %v1804_v2  ;;  %2076 = vmatpush.msrb.mxu3 %v2043_v51  ;;  %v2040_v36 = vld [vmem:[%s4067_s5 + $0x38] sm:$0xff] }
 0x37f   : > { %1707 = vst.msk [vmem:[#allocation3 + $0x71] sm:$0xff] %vm299_vm3, %v1698_v11  ;;  %v2039_v11 = vld [vmem:[%s4067_s5 + $0x30] sm:$0xff] }
 0x380   : > { %2077 = vmatpush.msrb.mxu3 %v2042_v49 }
 0x381   : > { %2475 = vrot.lane.b32.xlu1 %v2474_v10, %s2581_s14 }
 0x382   : > { %v1689_v50 = vpop.f32.mrf.mxu3  ;;  %2078 = vmatpush.msrb.mxu3 %v2041_v32 }
 0x383   : > { %v1690_v60 = vadd.f32 %v1689_v50, %v1649_v42  ;;  %2265 = vmatmul.msk.f32.gmra.mxu0 %vm299_vm3, %v1789_v26  ;;  %v2035_v42 = vld [vmem:[%s4067_s5 + $0x10] sm:$0xff] }
 0x384   : > { %2079 = vmatpush.msrb.mxu3 %v2040_v36 }
 0x385   : > { %v1699_v6 = vmax.f32 %v1690_v60, 0.0  ;;  %2495 = vrot.lane.b32.xlu0 %v2494_v29, %s2575_s12  ;;  %2485 = vrot.lane.b32.xlu2 %v2474_v10, %s2572_s9  ;;  %v2036_v10 = vld [vmem:[%s4067_s5 + $0x18] sm:$0xff]  ;;  %v2033_v29 = vld [vmem:[%s4067_s5] sm:$0xff] }
 0x386   : > { %v3860_v22 = vld [vmem:[#allocation3 + $0x70] sm:$0xff]  ;;  %v1724_v20 = vld [vmem:[#allocation3 + $0x78] sm:$0x3]  ;;  %2080 = vmatpush.msrb.mxu3 %v2039_v11 }
 0x387   : > { %1708 = vst.msk [vmem:[#allocation3 + $0x81] sm:$0xff] %vm299_vm3, %v1699_v6  ;;  %v1790_v47 = vrot.slane %v3860_v22, 2  ;;  %v1791_v27 = vrot.slane %v1724_v20, 2  ;;  %v1767_v43 = vrot.slane %v1724_v20, 1  ;;  %v1766_v33 = vrot.slane %v3860_v22, 1 }
 0x388   : > { %v2524_v53 = vpack.i.bf16 %v3860_v22, %v3844_v31  ;;  %2081 = vmatpush.msrb.mxu3 %v2038_v57 }
 0x389   : > { %2480 = vrot.lane.b32.xlu1 %v2479_v19, %s2580_s11  ;;  %v1792_v46 = vsel %vm402_vm1, %v1790_v47, %v1791_v27  ;;  %v1768_v52 = vsel %vm377_vm0, %v1766_v33, %v1767_v43 }
 0x38a   : > { %2266 = vmatmul.msk.f32.vlgmr.msrb.gmra.mxu1 %vm299_vm3, %v1792_v46  ;;  %v2529_v17 = vpack.i.bf16 %v1768_v52, %v1765_v8  ;;  %v2539_v12 = vpack.i.bf16 %v1792_v46, %v1789_v26  ;;  %2082 = vmatpush.msrb.mxu3 %v2037_v54  ;;  %v2034_v26 = vld [vmem:[%s4067_s5 + $0x8] sm:$0xff] }
 0x38c   : > { %2083 = vmatpush.msrb.mxu3 %v2036_v10 }
 0x38d   : > { %2500 = vrot.lane.b32.xlu0 %v2499_v39, %s2572_s9  ;;  %2490 = vrot.lane.b32.xlu2 %v2499_v39, %s2581_s14 }
 0x38e   : > { %v1725_v34 = vld [vmem:[#allocation3 + $0x80] sm:$0xff]  ;;  %v1726_v4 = vld [vmem:[#allocation3 + $0x88] sm:$0x3]  ;;  %2084 = vmatpush.msrb.mxu3 %v2035_v42 }
 0x38f   : > { %v1798_v41 = vrot.slane %v1725_v34, 2  ;;  %v1799_v13 = vrot.slane %v1726_v4, 2  ;;  %v1796_v28 = vrot.slane %v1726_v4, 1  ;;  %v1795_v45 = vrot.slane %v1725_v34, 1 }
 0x390   : > { %v2544_v56 = vpack.i.bf16 %v1725_v34, %v3860_v22  ;;  %2085 = vmatpush.msrb.mxu3 %v2034_v26 }
 0x391   : > { %2505 = vrot.lane.b32.xlu1 %v2504_v9, %s2575_s12  ;;  %v1800_v16 = vsel %vm402_vm1, %v1798_v41, %v1799_v13  ;;  %v1797_v5 = vsel %vm377_vm0, %v1795_v45, %v1796_v28 }
 0x392   : > { %2267 = vmatmul.msk.f32.gmra.mxu1 %vm299_vm3, %v1800_v16  ;;  %v2549_v44 = vpack.i.bf16 %v1797_v5, %v1768_v52  ;;  %2086 = vmatpush.msrb.mxu3 %v2033_v29 }
 0x395   : > { %2515 = vrot.lane.b32.xlu0 %v2514_v61, %s2576_s13  ;;  %2510 = vrot.lane.b32.xlu2 %v2509_v15, %s2573_s10 }
 0x399   : > { %2520 = vrot.lane.b32.xlu1 %v2519_v25, %s2579_s26 }
 0x39d   : > { %2530 = vrot.lane.b32.xlu0 %v2529_v17, %s2581_s14  ;;  %2525 = vrot.lane.b32.xlu2 %v2524_v53, %s2580_s11 }
 0x3a1   : > { %2535 = vrot.lane.b32.xlu1 %v2529_v17, %s2572_s9 }
 0x3a5   : > { %2545 = vrot.lane.b32.xlu0 %v2544_v56, %s2573_s10  ;;  %2540 = vrot.lane.b32.xlu2 %v2539_v12, %s2575_s12 }
 0x3a9   : > { %2550 = vrot.lane.b32.xlu1 %v2549_v44, %s2576_s13 }
 0x3ad   : > { %1941 = vrot.lane.b32.xlu0 %v1725_v34, %s2580_s11  ;;  %1917 = vrot.lane.b32.xlu2 %v1792_v46, %s2579_s26 }
 0x3b1   : > { %1965 = vrot.lane.b32.xlu1 %v1797_v5, %s2581_s14 }
 0x3b5   : > { %1943 = vrot.lane.b32.xlu0 %v3916_v14, %s2580_s11  ;;  %1919 = vrot.lane.b32.xlu2 %v1800_v16, %s2579_s26 }
 0x3b9   : > { %1967 = vrot.lane.b32.xlu1 %v1805_v58, %s2581_s14 }
 0x3c7   : > { %v3952_v50 = vpop.permute.xlu2 %2435 }
 0x3c8   : > { %v2437_v58 = vunpack.i.l.bf16 %v3952_v50 }
 0x3cf   : > { %v2451_v60 = vpop.permute.xlu2 %2450 }
 0x3d0   : > { %v2452_v59 = vunpack.i.l.bf16 %v2451_v60  ;;  %v2453_v61 = vunpack.i.h.bf16 %v2451_v60 }
 0x3d7   : > { %v2471_v20 = vpop.permute.xlu2 %2470 }
 0x3d8   : > { %v2472_v8 = vunpack.i.l.bf16 %v2471_v20  ;;  %v2473_v5 = vunpack.i.h.bf16 %v2471_v20 }
 0x3db   : > { %v2431_v55 = vpop.permute.xlu1 %2430 }
 0x3dc   : > { %v2432_v3 = vunpack.i.l.bf16 %v2431_v55  ;;  %v2433_v60 = vunpack.i.h.bf16 %v2431_v55 }
 0x3df   : > { %v3960_v63 = vpop.permute.xlu0 %2440  ;;  %v2486_v4 = vpop.permute.xlu2 %2485 }
 0x3e0   : > { %v2487_v53 = vunpack.i.l.bf16 %v2486_v4  ;;  %v2488_v30 = vunpack.i.h.bf16 %v2486_v4  ;;  %v2442_v54 = vunpack.i.l.bf16 %v3960_v63 }
 0x3e2   : > { %v1979_v38 = vsel %vm299_vm3, %v3768_v24, %v2487_v53  ;;  %v1980_v24 = vsel %vm299_vm3, %v3781_v0, %v2488_v30 }
 0x3e3   : > { %v2446_v6 = vpop.permute.xlu1 %2445 }
 0x3e4   : > { %v2447_v19 = vunpack.i.l.bf16 %v2446_v6  ;;  %v2448_v7 = vunpack.i.h.bf16 %v2446_v6 }
 0x3e6   : > { %v1977_v27 = vsel %vm299_vm3, %v3774_v21, %v2447_v19  ;;  %v1978_v16 = vsel %vm299_vm3, %v3784_v18, %v2448_v7  ;;  %v2443_v7 = vunpack.i.h.bf16 %v3960_v63 }
 0x3e7   : > { %v2456_v47 = vpop.permute.xlu0 %2455  ;;  %v1985_v39 = vsel %vm661_vm5, %v1977_v27, %v2452_v59  ;;  %v1986_v33 = vsel %vm661_vm5, %v1978_v16, %v2453_v61  ;;  %v2491_v44 = vpop.permute.xlu2 %2490 }
 0x3e8   : > { %v2457_v46 = vunpack.i.l.bf16 %v2456_v47  ;;  %v2458_v21 = vunpack.i.h.bf16 %v2456_v47  ;;  %v2438_v47 = vunpack.i.h.bf16 %v3952_v50 }
 0x3ea   : > { %v1993_v9 = vsel %vm679_vm7, %v1985_v39, %v2457_v46  ;;  %v1994_v45 = vsel %vm679_vm7, %v1986_v33, %v2458_v21  ;;  %v2492_v46 = vunpack.i.l.bf16 %v2491_v44 }
 0x3eb   : > { %v2466_v48 = vpop.permute.xlu1 %2465 }
 0x3ec   : > { %v2467_v34 = vunpack.i.l.bf16 %v2466_v48  ;;  %v2468_v25 = vunpack.i.h.bf16 %v2466_v48 }
 0x3ee   : > { %v2001_v41 = vsel %vm697_vm9, %v1993_v9, %v2467_v34  ;;  %v2002_v56 = vsel %vm697_vm9, %v1994_v45, %v2468_v25  ;;  %v1806_v25 = vrot.slane %v3916_v14, 2 }
 0x3ef   : > { %v2461_v13 = vpop.permute.xlu0 %2460  ;;  %v2009_v43 = vsel %vm1098_vm12, %v2001_v41, %v2472_v8  ;;  %v2010_v51 = vsel %vm1098_vm12, %v2002_v56, %v2473_v5  ;;  %v2511_v20 = vpop.permute.xlu2 %2510 }
 0x3f0   : > { %v2462_v15 = vunpack.i.l.bf16 %v2461_v13  ;;  %v2463_v23 = vunpack.i.h.bf16 %v2461_v13  ;;  %v2512_v13 = vunpack.i.l.bf16 %v2511_v20  ;;  %v2513_v14 = vunpack.i.h.bf16 %v2511_v20 }
 0x3f2   : > { %v2017_v28 = vsel %vm1107_vm13, %v2009_v43, %v2462_v15  ;;  %v2018_v11 = vsel %vm1107_vm13, %v2010_v51, %v2463_v23  ;;  %v2493_v15 = vunpack.i.h.bf16 %v2491_v44 }
 0x3f3   : > { %v2476_v52 = vpop.permute.xlu1 %2475 }
 0x3f4   : > { %v2477_v17 = vunpack.i.l.bf16 %v2476_v52  ;;  %v2478_v35 = vunpack.i.h.bf16 %v2476_v52 }
 0x3f6   : > { %v2025_v12 = vsel %vm1116_vm14, %v2017_v28, %v2477_v17  ;;  %v2026_v10 = vsel %vm1116_vm14, %v2018_v11, %v2478_v35  ;;  %v1807_v28 = vrot.slane %v3907_v40, 2 }
 0x3f7   : > { %v2496_v18 = vpop.permute.xlu0 %2495  ;;  %2087 = vmatmul.f32.vlgmr.msrb.gmra.mxu3 %v2025_v12  ;;  %v2526_v21 = vpop.permute.xlu2 %2525 }
 0x3f8   : > { %v2497_v62 = vunpack.i.l.bf16 %v2496_v18  ;;  %v2498_v49 = vunpack.i.h.bf16 %v2496_v18  ;;  %v2527_v56 = vunpack.i.l.bf16 %v2526_v21  ;;  %v1808_v5 = vsel %vm402_vm1, %v1806_v25, %v1807_v28 }
 0x3f9   : > { %2268 = vmatmul.msk.f32.gmra.mxu1 %vm299_vm3, %v1808_v5 }
 0x3fa   : > { %v1987_v2 = vsel %vm661_vm5, %v1979_v38, %v2497_v62  ;;  %v1988_v42 = vsel %vm661_vm5, %v1980_v24, %v2498_v49 }
 0x3fb   : > { %v1995_v32 = vsel %vm679_vm7, %v1987_v2, %v2432_v3  ;;  %v2481_v36 = vpop.permute.xlu1 %2480  ;;  %v1996_v19 = vsel %vm679_vm7, %v1988_v42, %v2433_v60 }
 0x3fc   : > { %v2003_v57 = vsel %vm697_vm9, %v1995_v32, %v2437_v58  ;;  %v2482_v26 = vunpack.i.l.bf16 %v2481_v36  ;;  %v2004_v48 = vsel %vm697_vm9, %v1996_v19, %v2438_v47  ;;  %v2483_v55 = vunpack.i.h.bf16 %v2481_v36 }
 0x3fd   : > { %v2011_v6 = vsel %vm1098_vm12, %v2003_v57, %v2442_v54  ;;  %v2012_v50 = vsel %vm1098_vm12, %v2004_v48, %v2443_v7  ;;  %v2528_v32 = vunpack.i.h.bf16 %v2526_v21 }
 0x3fe   : > { %v2019_v59 = vsel %vm1107_vm13, %v2011_v6, %v2482_v26  ;;  %v2020_v61 = vsel %vm1107_vm13, %v2012_v50, %v2483_v55 }
 0x3ff   : > { %v2501_v29 = vpop.permute.xlu0 %2500  ;;  %2090 = vmatmul.f32.gmra.mxu3 %v2026_v10  ;;  %v2027_v34 = vsel %vm1116_vm14, %v2019_v59, %v2492_v46 }
 0x400   : > { %v2502_v0 = vunpack.i.l.bf16 %v2501_v29  ;;  %v2503_v63 = vunpack.i.h.bf16 %v2501_v29 }
 0x402   : > { %v1981_v9 = vsel %vm299_vm3, %v3786_v1, %v2502_v0  ;;  %v2028_v1 = vsel %vm1116_vm14, %v2020_v61, %v2493_v15  ;;  %v1982_v45 = vsel %vm299_vm3, %v3830_v37, %v2503_v63  ;;  %v2541_v37 = vpop.permute.xlu2 %2540 }
 0x403   : > { %v2506_v27 = vpop.permute.xlu1 %2505  ;;  %v2542_v36 = vunpack.i.l.bf16 %v2541_v37 }
 0x404   : > { %v2507_v39 = vunpack.i.l.bf16 %v2506_v27  ;;  %v2508_v52 = vunpack.i.h.bf16 %v2506_v27  ;;  %v2543_v27 = vunpack.i.h.bf16 %v2541_v37 }
 0x406   : > { %v1989_v41 = vsel %vm661_vm5, %v1981_v9, %v2507_v39  ;;  %v1990_v18 = vsel %vm661_vm5, %v1982_v45, %v2508_v52 }
 0x407   : > { %v2516_v4 = vpop.permute.xlu0 %2515  ;;  %2093 = vmatmul.f32.gmra.mxu3 %v2027_v34  ;;  %v1997_v43 = vsel %vm679_vm7, %v1989_v41, %v2512_v13  ;;  %v1998_v40 = vsel %vm679_vm7, %v1990_v18, %v2513_v14 }
 0x408   : > { %v2517_v8 = vunpack.i.l.bf16 %v2516_v4  ;;  %v2518_v62 = vunpack.i.h.bf16 %v2516_v4 }
 0x40a   : > { %v2005_v17 = vsel %vm697_vm9, %v1997_v43, %v2517_v8  ;;  %v2006_v2 = vsel %vm697_vm9, %v1998_v40, %v2518_v62  ;;  %v1918_v20 = vpop.permute.xlu2 %1917  ;;  %v2129_v8 = vpop.f32.mrf.mxu0 }
 0x40b   : > { %v2521_v16 = vpop.permute.xlu1 %2520 }
 0x40c   : > { %v2522_v33 = vunpack.i.l.bf16 %v2521_v16  ;;  %v2523_v23 = vunpack.i.h.bf16 %v2521_v16  ;;  %v2555_v16 = vld [vmem:[%s4068_s6] ss:$0 sm:$0xff] }
 0x40e   : > { %v2013_v12 = vsel %vm1098_vm12, %v2005_v17, %v2522_v33  ;;  %v2014_v49 = vsel %vm1098_vm12, %v2006_v2, %v2523_v23 }
 0x40f   : > { %v2531_v53 = vpop.permute.xlu0 %2530  ;;  %2096 = vmatmul.f32.gmra.mxu3 %v2028_v1  ;;  %v2021_v38 = vsel %vm1107_vm13, %v2013_v12, %v2527_v56  ;;  %v2022_v10 = vsel %vm1107_vm13, %v2014_v49, %v2528_v32 }
 0x410   : > { %v2532_v44 = vunpack.i.l.bf16 %v2531_v53  ;;  %v2533_v11 = vunpack.i.h.bf16 %v2531_v53 }
 0x412   : > { %v2029_v35 = vsel %vm1116_vm14, %v2021_v38, %v2532_v44  ;;  %v2030_v60 = vsel %vm1116_vm14, %v2022_v10, %v2533_v11  ;;  %v2132_v63 = vpop.f32.mrf.mxu0 }
 0x413   : > { %v2536_v3 = vpop.permute.xlu1 %2535 }
 0x414   : > { %v2537_v30 = vunpack.i.l.bf16 %v2536_v3  ;;  %v2538_v26 = vunpack.i.h.bf16 %v2536_v3 }
 0x416   : > { %v1983_v58 = vsel %vm299_vm3, %v3844_v31, %v2537_v30  ;;  %v1984_v19 = vsel %vm299_vm3, %v3860_v22, %v2538_v26  ;;  %v1920_v22 = vpop.permute.xlu2 %1919  ;;  %v2144_v30 = vpop.f32.mrf.mxu1 }
 0x417   : > { %v2546_v51 = vpop.permute.xlu0 %2545  ;;  %2099 = vmatmul.f32.gmra.mxu3 %v2029_v35  ;;  %v1991_v54 = vsel %vm661_vm5, %v1983_v58, %v2542_v36  ;;  %v1992_v0 = vsel %vm661_vm5, %v1984_v19, %v2543_v27 }
 0x418   : > { %v2547_v57 = vunpack.i.l.bf16 %v2546_v51  ;;  %v2548_v46 = vunpack.i.h.bf16 %v2546_v51 }
 0x41a   : > { %v1999_v29 = vsel %vm679_vm7, %v1991_v54, %v2547_v57  ;;  %v2000_v34 = vsel %vm679_vm7, %v1992_v0, %v2548_v46  ;;  %v2135_v17 = vpop.f32.mrf.mxu0 }
 0x41b   : > { %v2551_v24 = vpop.permute.xlu1 %2550 }
 0x41c   : > { %v2552_v42 = vunpack.i.l.bf16 %v2551_v24  ;;  %v2553_v39 = vunpack.i.h.bf16 %v2551_v24 }
 0x41e   : > { %v2007_v6 = vsel %vm697_vm9, %v1999_v29, %v2552_v42  ;;  %v2008_v55 = vsel %vm697_vm9, %v2000_v34, %v2553_v39  ;;  %v2147_v58 = vpop.f32.mrf.mxu1 }
 0x41f   : > { %2102 = vmatmul.f32.gmra.mxu3 %v2030_v60  ;;  %v1942_v31 = vpop.permute.xlu0 %1941  ;;  %v2015_v47 = vsel %vm1098_vm12, %v2007_v6, %v1918_v20  ;;  %v2016_v50 = vsel %vm1098_vm12, %v2008_v55, %v1920_v22 }
 0x420   : > { %v2023_v48 = vsel %vm1107_vm13, %v2015_v47, %v1942_v31 }
 0x422   : > { %v2138_v56 = vpop.f32.mrf.mxu0 }
 0x423   : > { %v1966_v59 = vpop.permute.xlu1 %1965 }
 0x424   : > { %v2031_v7 = vsel %vm1116_vm14, %v2023_v48, %v1966_v59 }
 0x427   : > { %2105 = vmatmul.f32.gmra.mxu3 %v2031_v7  ;;  %v1944_v4 = vpop.permute.xlu0 %1943 }
 0x428   : > { %v2024_v41 = vsel %vm1107_vm13, %v2016_v50, %v1944_v4 }
 0x42a   : > { %v2141_v38 = vpop.f32.mrf.mxu0 }
 0x42b   : > { %v1968_v9 = vpop.permute.xlu1 %1967 }
 0x42c   : > { %v2032_v13 = vsel %vm1116_vm14, %v2024_v41, %v1968_v9 }
 0x42f   : > { %2108 = vmatmul.f32.gmra.mxu3 %v2032_v13 }
 0x476   : > { %v2150_v54 = vpop.f32.mrf.mxu1 }
 0x47a   : > { %v2088_v61 = vpop.f32.mrf.mxu3 }
 0x47b   : > { %v2089_v15 = vadd.f32 %v2555_v16, %v2088_v61 }
 0x47d   : > { %v2130_v21 = vadd.f32 %v2129_v8, %v2089_v15 }
 0x47f   : > { %v2153_v43 = vmax.f32 %v2130_v21, 0.0 }
 0x481   : > { %2161 = vst.msk [vmem:[%s4041_s21] sm:$0xff] %vm299_vm3, %v2153_v43 }
 0x482   : > { %v2091_v33 = vpop.f32.mrf.mxu3 }
 0x483   : > { %v2092_v25 = vadd.f32 %v2555_v16, %v2091_v33 }
 0x485   : > { %v2133_v52 = vadd.f32 %v2132_v63, %v2092_v25 }
 0x487   : > { %v2154_v1 = vmax.f32 %v2133_v52, 0.0 }
 0x489   : > { %2162 = vst.msk [vmem:[%s4041_s21 + $0x8] sm:$0xff] %vm299_vm3, %v2154_v1 }
 0x48a   : > { %v2094_v53 = vpop.f32.mrf.mxu3 }
 0x48b   : > { %v2095_v28 = vadd.f32 %v2555_v16, %v2094_v53 }
 0x48d   : > { %v2136_v45 = vadd.f32 %v2135_v17, %v2095_v28 }
 0x48f   : > { %v2155_v12 = vmax.f32 %v2136_v45, 0.0 }
 0x491   : > { %2163 = vst.msk [vmem:[%s4041_s21 + $0x10] sm:$0xff] %vm299_vm3, %v2155_v12 }
 0x492   : > { %v2097_v18 = vpop.f32.mrf.mxu3 }
 0x493   : > { %v2098_v5 = vadd.f32 %v2555_v16, %v2097_v18 }
 0x495   : > { %v2139_v14 = vadd.f32 %v2138_v56, %v2098_v5 }
 0x497   : > { %v2156_v44 = vmax.f32 %v2139_v14, 0.0 }
 0x499   : > { %2164 = vst.msk [vmem:[%s4041_s21 + $0x18] sm:$0xff] %vm299_vm3, %v2156_v44 }
 0x49a   : > { %v2100_v62 = vpop.f32.mrf.mxu3 }
 0x49b   : > { %v2101_v3 = vadd.f32 %v2555_v16, %v2100_v62 }
 0x49d   : > { %v2142_v40 = vadd.f32 %v2141_v38, %v2101_v3 }
 0x49f   : > { %v2157_v23 = vmax.f32 %v2142_v40, 0.0 }
 0x4a1   : > { %2165 = vst.msk [vmem:[%s4041_s21 + $0x20] sm:$0xff] %vm299_vm3, %v2157_v23 }
 0x4a2   : > { %v2103_v37 = vpop.f32.mrf.mxu3 }
 0x4a3   : > { %v2104_v35 = vadd.f32 %v2555_v16, %v2103_v37 }
 0x4a5   : > { %v2145_v2 = vadd.f32 %v2144_v30, %v2104_v35 }
 0x4a7   : > { %v2158_v51 = vmax.f32 %v2145_v2, 0.0 }
 0x4a9   : > { %2166 = vst.msk [vmem:[%s4041_s21 + $0x28] sm:$0xff] %vm299_vm3, %v2158_v51 }
 0x4aa   : > { %v2106_v49 = vpop.f32.mrf.mxu3 }
 0x4ab   : > { %v2107_v32 = vadd.f32 %v2555_v16, %v2106_v49 }
 0x4ad   : > { %v2148_v36 = vadd.f32 %v2147_v58, %v2107_v32 }
 0x4af   : > { %v2159_v11 = vmax.f32 %v2148_v36, 0.0 }
 0x4b1   : > { %2167 = vst.msk [vmem:[%s4041_s21 + $0x30] sm:$0xff] %vm299_vm3, %v2159_v11 }
 0x4b2   : > { %v2109_v57 = vpop.f32.mrf.mxu3 }
 0x4b3   : > { %v2110_v24 = vadd.f32 %v2555_v16, %v2109_v57 }
 0x4b5   : > { %v2151_v10 = vadd.f32 %v2150_v54, %v2110_v24 }
 0x4b7   : > { %v2160_v42 = vmax.f32 %v2151_v10, 0.0 }
 0x4b9   : > { %2168 = vst.msk [vmem:[%s4041_s21 + $0x38] sm:$0xff] %vm299_vm3, %v2160_v42 }
 0x4ba PF: > { %s17_s24 = sadd.s32 1, %s2568_s24  }
 0x4bb   : > { %p14_p4 = scmp.ge.s32.totalorder %s17_s24, 4  }
 0x4bd   :  { %16 = sbr.rel (!%p14_p4) target bundleno = 1 (0x1), region = 83 }

</bundles_post_ra>
